<compile_context>
chip_gen: v7x
topology: tpu7x:2x2x1
jax: 0.10.0
libtpu: 0.0.40
codegen_flags: <defaults>
</compile_context>

<pallas_src>
import functools

import jax
import jax.numpy as jnp
import numpy as np
from jax import lax
from jax.experimental import pallas as pl
from jax.experimental.pallas import tpu as pltpu


# ----------------------------- Pallas kernel --------------------------------
def _transformer_block_kernel(
    x_ref,                       # (Bb, T, E)  folded batch slab
    wq_ref, bq_ref,              # (E, A), (1, A)
    wk_ref, bk_ref,
    wv_ref, bv_ref,
    ln1g_ref, ln1b_ref,          # (1, A), (1, A)
    w1_ref, b1_ref,              # (A, F), (1, F)
    w2_ref, b2_ref,              # (F, A), (1, A)
    ln2g_ref, ln2b_ref,          # (1, A), (1, A)
    out_ref,                     # (Bb, T, A)
    *, num_heads: int, matmul_dtype,
):
    Bb, T, E = x_ref.shape
    A = wq_ref.shape[1]
    H = num_heads
    dh = A // H
    inv_scale = 1.0 / (dh ** 0.5)

    # ---- Q/K/V projections on the whole (Bb*T, E) slab: one MXU pass each.
    x = x_ref[...].reshape(Bb * T, E).astype(matmul_dtype)

    def linear_relu(w_ref, b_ref):
        y = jnp.dot(x, w_ref[...].astype(matmul_dtype),
                    preferred_element_type=jnp.float32)
        return jnp.maximum(y + b_ref[...], 0.0)

    q = linear_relu(wq_ref, bq_ref)            # (Bb*T, A) f32
    k = linear_relu(wk_ref, bk_ref)
    v = linear_relu(wv_ref, bv_ref)

    # ---- Multi-head attention: heads batched in one dot_general per sequence.
    # torch.chunk(., H, dim=2) == contiguous dh-wide feature slices == the
    # (T, H, dh) reshape below, so the head math is identical to the reference.
    q4 = q.reshape(Bb, T, H, dh).astype(matmul_dtype)
    k4 = k.reshape(Bb, T, H, dh).astype(matmul_dtype)
    v4 = v.reshape(Bb, T, H, dh).astype(matmul_dtype)

    attn_rows = []
    for b in range(Bb):                        # static, small Python loop
        # scores: (H, T, T) with H as the single batch dim of one dot_general
        s = jnp.einsum("qhd,khd->hqk", q4[b], k4[b],
                       preferred_element_type=jnp.float32) * inv_scale
        # numerically-stable softmax over the last axis (== F.softmax)
        s = s - jnp.max(s, axis=-1, keepdims=True)
        p = jnp.exp(s)
        p = p * pl.reciprocal(jnp.sum(p, axis=-1, keepdims=True), approx=True)
        o = jnp.einsum("hqk,khd->qhd", p.astype(matmul_dtype), v4[b],
                       preferred_element_type=jnp.float32)
        attn_rows.append(o.reshape(T, A))
    attn = attn_rows[0] if Bb == 1 else jnp.concatenate(attn_rows, axis=0)

    def layer_norm(z, g_ref, b_ref):           # all in f32
        inv_n = 1.0 / z.shape[-1]              # hoisted 1/N constant
        mu = jnp.sum(z, axis=-1, keepdims=True) * inv_n
        zc = z - mu
        var = jnp.sum(zc * zc, axis=-1, keepdims=True) * inv_n
        return zc * lax.rsqrt(var + 1e-5) * g_ref[...] + b_ref[...]

    # residual uses the *projected* q (as in the reference code), then LN.
    y = layer_norm(attn + q, ln1g_ref, ln1b_ref)           # (Bb*T, A)

    # ---- FeedForward: Linear+ReLU, Linear, residual, LN — full-slab matmuls.
    h1 = jnp.maximum(
        jnp.dot(y.astype(matmul_dtype), w1_ref[...].astype(matmul_dtype),
                preferred_element_type=jnp.float32) + b1_ref[...], 0.0)
    h2 = jnp.dot(h1.astype(matmul_dtype), w2_ref[...].astype(matmul_dtype),
                 preferred_element_type=jnp.float32) + b2_ref[...]
    out = layer_norm(h2 + y, ln2g_ref, ln2b_ref)

    # NOTE: lane-density of this store is governed by A; production configs
    # (A >= 128) get unmasked full-lane vst.
    out_ref[...] = out.reshape(Bb, T, A).astype(out_ref.dtype)


# ------------------------------ wrappers -------------------------------------
def _pick_batch_block(B, T, target_rows=256, max_rows=1024):
    """Smallest divisor of B whose Bb*T reaches `target_rows` MXU rows
    (capped at `max_rows` rows to bound the activation block in VMEM)."""
    best = 1
    for cand in range(1, B + 1):
        if B % cand != 0:
            continue
        if cand * T <= max_rows:
            best = cand
        if cand * T >= target_rows:
            break
    return best


def transformer_block(x, p, num_heads, *, batch_block=None,
                      matmul_dtype=jnp.float32):
    """One MHA+FFN block. Grid is over batch, with `batch_block` batch elements
    folded into each grid step so matmuls see Bb*T rows.

    matmul_dtype=jnp.bfloat16 feeds the MXU bf16 inputs (recommended on
    v6e/v7x); softmax/LayerNorm always run in f32.
    On v7x, pass batch_block=B//2 (or smaller) if you want >=2 grid steps so
    both TensorCores get work.
    """
    B, T, E = x.shape
    A = p["wq"].shape[1]
    F = p["w1"].shape[1]
    assert A % num_heads == 0, "attention_size must be divisible by num_heads"

    Bb = _pick_batch_block(B, T) if batch_block is None else batch_block
    assert B % Bb == 0, "batch_block must divide batch"

    def replicated(shape):
        # grid-invariant operand (weights/biases): DMA'd once, then reused.
        return pl.BlockSpec(shape, lambda b: (0,) * len(shape))

    in_specs = [
        pl.BlockSpec((Bb, T, E), lambda b: (b, 0, 0)),  # x
        replicated((E, A)), replicated((1, A)),         # Wq, bq
        replicated((E, A)), replicated((1, A)),         # Wk, bk
        replicated((E, A)), replicated((1, A)),         # Wv, bv
        replicated((1, A)), replicated((1, A)),         # ln1 gamma, beta
        replicated((A, F)), replicated((1, F)),         # W1, b1
        replicated((F, A)), replicated((1, A)),         # W2, b2
        replicated((1, A)), replicated((1, A)),         # ln2 gamma, beta
    ]
    out_specs = pl.BlockSpec((Bb, T, A), lambda b: (b, 0, 0))

    kernel = functools.partial(_transformer_block_kernel,
                               num_heads=num_heads, matmul_dtype=matmul_dtype)
    return pl.pallas_call(
        kernel,
        out_shape=jax.ShapeDtypeStruct((B, T, A), jnp.float32),
        grid=(B // Bb,),
        in_specs=in_specs,
        out_specs=out_specs,
        compiler_params=pltpu.CompilerParams(
            dimension_semantics=("parallel",),
            vmem_limit_bytes=48 * 1024 * 1024),
    )(x, p["wq"], p["bq"], p["wk"], p["bk"], p["wv"], p["bv"],
      p["ln1g"], p["ln1b"], p["w1"], p["b1"], p["w2"], p["b2"],
      p["ln2g"], p["ln2b"])


def transformer_layer(query, blocks_params, num_heads, **kwargs):
    """Matches TransformerLayer.forward: every block's MHA reads the ORIGINAL
    query, its FFN reads that block's MHA output, and only the LAST block's
    result is returned. Earlier blocks are therefore dead compute — we only
    execute the last block (bit-identical output, (N-1)/N less work)."""
    if not blocks_params:
        return None
    return transformer_block(query, blocks_params[-1], num_heads, **kwargs)


# ---------------------------- pure-JAX reference ------------------------------
def _ref_block(x, p, num_heads):
    B, T, E = x.shape
    A = p["wq"].shape[1]
    dh = A // num_heads

    def lin_relu(w, b):
        return jnp.maximum(x @ w + b, 0.0)

    q = lin_relu(p["wq"], p["bq"])
    k = lin_relu(p["wk"], p["bk"])
    v = lin_relu(p["wv"], p["bv"])
    qh = q.reshape(B, T, num_heads, dh)
    kh = k.reshape(B, T, num_heads, dh)
    vh = v.reshape(B, T, num_heads, dh)
    s = jnp.einsum("bqhd,bkhd->bhqk", qh, kh) / (dh ** 0.5)
    a = jax.nn.softmax(s, axis=-1)
    o = jnp.einsum("bhqk,bkhd->bqhd", a, vh).reshape(B, T, A)

    def ln(z, g, b):
        mu = jnp.mean(z, axis=-1, keepdims=True)
        var = jnp.mean((z - mu) ** 2, axis=-1, keepdims=True)
        return (z - mu) / jnp.sqrt(var + 1e-5) * g + b

    y = ln(o + q, p["ln1g"], p["ln1b"])
    h1 = jnp.maximum(y @ p["w1"] + p["b1"], 0.0)
    h2 = h1 @ p["w2"] + p["b2"] + y
    return ln(h2, p["ln2g"], p["ln2b"])


def _ref_layer(query, blocks_params, num_heads):
    out = None
    for p in blocks_params:              # full loop, mirrors the PyTorch code
        out = _ref_block(query, p, num_heads)
    return out


# ------------------------------- parameters ----------------------------------
def init_block_params(key, E, A, F):
    ks = jax.random.split(key, 10)
    s = 0.1
    return dict(
        wq=jax.random.normal(ks[0], (E, A), jnp.float32) * s,
        bq=jax.random.normal(ks[1], (1, A), jnp.float32) * 0.02,
        wk=jax.random.normal(ks[2], (E, A), jnp.float32) * s,
        bk=jax.random.normal(ks[3], (1, A), jnp.float32) * 0.02,
        wv=jax.random.normal(ks[4], (E, A), jnp.float32) * s,
        bv=jax.random.normal(ks[5], (1, A), jnp.float32) * 0.02,
        ln1g=jnp.ones((1, A), jnp.float32),      # PyTorch LayerNorm default init
        ln1b=jnp.zeros((1, A), jnp.float32),
        w1=jax.random.normal(ks[6], (A, F), jnp.float32) * s,
        b1=jax.random.normal(ks[7], (1, F), jnp.float32) * 0.02,
        w2=jax.random.normal(ks[8], (F, A), jnp.float32) * s,
        b2=jax.random.normal(ks[9], (1, A), jnp.float32) * 0.02,
        ln2g=jnp.ones((1, A), jnp.float32),
        ln2b=jnp.zeros((1, A), jnp.float32),
    )


if __name__ == "__main__":
    # Small shapes consistent with the module: out_dim == attention_size ==
    # embedding_size (required for the residual adds in the reference code).
    B, T = 2, 8
    embedding_size = attention_size = out_dim = 32
    num_heads = 4
    dim_feedforward = 64
    block_nums = 2

    key = jax.random.PRNGKey(0)
    key, xk = jax.random.split(key)
    query = jax.random.normal(xk, (B, T, embedding_size), jnp.float32)

    block_keys = jax.random.split(key, block_nums)
    blocks_params = [
        init_block_params(block_keys[i], embedding_size, attention_size,
                          dim_feedforward)
        for i in range(block_nums)
    ]

    ref = jax.block_until_ready(_ref_layer(query, blocks_params, num_heads))

    # f32-matmul path (default; v5e-safe). Tolerance slightly above 1e-3 only
    # because the softmax denominator uses the approximate EUP reciprocal.
    out = jax.block_until_ready(
        transformer_layer(query, blocks_params, num_heads))
    np.testing.assert_allclose(np.asarray(out), np.asarray(ref),
                               rtol=5e-3, atol=5e-3)

    # bf16-MXU-input path (v6e/v7x throughput); looser tolerance for bf16
    # operand rounding — softmax/LayerNorm still run in f32.
    out_bf16 = jax.block_until_ready(
        transformer_layer(query, blocks_params, num_heads,
                          matmul_dtype=jnp.bfloat16))
    np.testing.assert_allclose(np.asarray(out_bf16), np.asarray(ref),
                               rtol=5e-2, atol=5e-2)

    print("KERNEL_OK")
</pallas_src>

<mosaic_0001>
module attributes {stable_mosaic.version = 11 : i64} {
  func.func @_transformer_block_kernel(%arg0: i32, %arg1: memref<2x8x32xf32, #tpu.memory_space<vmem>>, %arg2: memref<32x32xf32, #tpu.memory_space<vmem>>, %arg3: memref<1x32xf32, #tpu.memory_space<vmem>>, %arg4: memref<32x32xf32, #tpu.memory_space<vmem>>, %arg5: memref<1x32xf32, #tpu.memory_space<vmem>>, %arg6: memref<32x32xf32, #tpu.memory_space<vmem>>, %arg7: memref<1x32xf32, #tpu.memory_space<vmem>>, %arg8: memref<1x32xf32, #tpu.memory_space<vmem>>, %arg9: memref<1x32xf32, #tpu.memory_space<vmem>>, %arg10: memref<32x64xf32, #tpu.memory_space<vmem>>, %arg11: memref<1x64xf32, #tpu.memory_space<vmem>>, %arg12: memref<64x32xf32, #tpu.memory_space<vmem>>, %arg13: memref<1x32xf32, #tpu.memory_space<vmem>>, %arg14: memref<1x32xf32, #tpu.memory_space<vmem>>, %arg15: memref<1x32xf32, #tpu.memory_space<vmem>>, %arg16: memref<2x8x32xf32, #tpu.memory_space<vmem>>) attributes {dimension_semantics = [#tpu.dimension_semantics<parallel>], iteration_bounds = array<i64: 1>, scalar_prefetch = 0 : i64, scratch_operands = 0 : i64, tpu.core_type = #tpu.core_type<tc>, window_params = [{transform_indices = @transform_0, window_bounds = array<i64: 2, 8, 32>}, {pipeline_mode = #tpu.pipeline_mode<synchronous>, transform_indices = @transform_1, window_bounds = array<i64: 32, 32>}, {pipeline_mode = #tpu.pipeline_mode<synchronous>, transform_indices = @transform_2, window_bounds = array<i64: 1, 32>}, {pipeline_mode = #tpu.pipeline_mode<synchronous>, transform_indices = @transform_3, window_bounds = array<i64: 32, 32>}, {pipeline_mode = #tpu.pipeline_mode<synchronous>, transform_indices = @transform_4, window_bounds = array<i64: 1, 32>}, {pipeline_mode = #tpu.pipeline_mode<synchronous>, transform_indices = @transform_5, window_bounds = array<i64: 32, 32>}, {pipeline_mode = #tpu.pipeline_mode<synchronous>, transform_indices = @transform_6, window_bounds = array<i64: 1, 32>}, {pipeline_mode = #tpu.pipeline_mode<synchronous>, transform_indices = @transform_7, window_bounds = array<i64: 1, 32>}, {pipeline_mode = #tpu.pipeline_mode<synchronous>, transform_indices = @transform_8, window_bounds = array<i64: 1, 32>}, {pipeline_mode = #tpu.pipeline_mode<synchronous>, transform_indices = @transform_9, window_bounds = array<i64: 32, 64>}, {pipeline_mode = #tpu.pipeline_mode<synchronous>, transform_indices = @transform_10, window_bounds = array<i64: 1, 64>}, {pipeline_mode = #tpu.pipeline_mode<synchronous>, transform_indices = @transform_11, window_bounds = array<i64: 64, 32>}, {pipeline_mode = #tpu.pipeline_mode<synchronous>, transform_indices = @transform_12, window_bounds = array<i64: 1, 32>}, {pipeline_mode = #tpu.pipeline_mode<synchronous>, transform_indices = @transform_13, window_bounds = array<i64: 1, 32>}, {pipeline_mode = #tpu.pipeline_mode<synchronous>, transform_indices = @transform_14, window_bounds = array<i64: 1, 32>}, {transform_indices = @transform_15, window_bounds = array<i64: 2, 8, 32>}]} {
    %c0 = arith.constant 0 : index
    %c0_0 = arith.constant 0 : index
    %c0_1 = arith.constant 0 : index
    %0 = vector.load %arg1[%c0, %c0_0, %c0_1] : memref<2x8x32xf32, #tpu.memory_space<vmem>>, vector<2x8x32xf32>
    %1 = vector.shape_cast %0 : vector<2x8x32xf32> to vector<16x32xf32>
    %c0_2 = arith.constant 0 : index
    %c0_3 = arith.constant 0 : index
    %2 = vector.load %arg2[%c0_2, %c0_3] : memref<32x32xf32, #tpu.memory_space<vmem>>, vector<32x32xf32>
    %cst = arith.constant dense<0.000000e+00> : vector<16x32xf32>
    %3 = tpu.matmul %1, %2, %cst {dimension_numbers = #tpu.dot_dimension_numbers<[1], [0], [0], [1], [0, 0, 1, 1], [], []>} : vector<16x32xf32>, vector<32x32xf32>, vector<16x32xf32> -> vector<16x32xf32>
    %c0_4 = arith.constant 0 : index
    %c0_5 = arith.constant 0 : index
    %4 = vector.load %arg3[%c0_4, %c0_5] : memref<1x32xf32, #tpu.memory_space<vmem>>, vector<1x32xf32>
    %5 = vector.broadcast %4 : vector<1x32xf32> to vector<16x32xf32>
    %6 = arith.addf %3, %5 : vector<16x32xf32>
    %cst_6 = arith.constant 0.000000e+00 : f32
    %7 = vector.broadcast %cst_6 : f32 to vector<16x32xf32>
    %8 = arith.maximumf %6, %7 : vector<16x32xf32>
    %c0_7 = arith.constant 0 : index
    %c0_8 = arith.constant 0 : index
    %9 = vector.load %arg4[%c0_7, %c0_8] : memref<32x32xf32, #tpu.memory_space<vmem>>, vector<32x32xf32>
    %cst_9 = arith.constant dense<0.000000e+00> : vector<16x32xf32>
    %10 = tpu.matmul %1, %9, %cst_9 {dimension_numbers = #tpu.dot_dimension_numbers<[1], [0], [0], [1], [0, 0, 1, 1], [], []>} : vector<16x32xf32>, vector<32x32xf32>, vector<16x32xf32> -> vector<16x32xf32>
    %c0_10 = arith.constant 0 : index
    %c0_11 = arith.constant 0 : index
    %11 = vector.load %arg5[%c0_10, %c0_11] : memref<1x32xf32, #tpu.memory_space<vmem>>, vector<1x32xf32>
    %12 = vector.broadcast %11 : vector<1x32xf32> to vector<16x32xf32>
    %13 = arith.addf %10, %12 : vector<16x32xf32>
    %cst_12 = arith.constant 0.000000e+00 : f32
    %14 = vector.broadcast %cst_12 : f32 to vector<16x32xf32>
    %15 = arith.maximumf %13, %14 : vector<16x32xf32>
    %c0_13 = arith.constant 0 : index
    %c0_14 = arith.constant 0 : index
    %16 = vector.load %arg6[%c0_13, %c0_14] : memref<32x32xf32, #tpu.memory_space<vmem>>, vector<32x32xf32>
    %cst_15 = arith.constant dense<0.000000e+00> : vector<16x32xf32>
    %17 = tpu.matmul %1, %16, %cst_15 {dimension_numbers = #tpu.dot_dimension_numbers<[1], [0], [0], [1], [0, 0, 1, 1], [], []>} : vector<16x32xf32>, vector<32x32xf32>, vector<16x32xf32> -> vector<16x32xf32>
    %c0_16 = arith.constant 0 : index
    %c0_17 = arith.constant 0 : index
    %18 = vector.load %arg7[%c0_16, %c0_17] : memref<1x32xf32, #tpu.memory_space<vmem>>, vector<1x32xf32>
    %19 = vector.broadcast %18 : vector<1x32xf32> to vector<16x32xf32>
    %20 = arith.addf %17, %19 : vector<16x32xf32>
    %cst_18 = arith.constant 0.000000e+00 : f32
    %21 = vector.broadcast %cst_18 : f32 to vector<16x32xf32>
    %22 = arith.maximumf %20, %21 : vector<16x32xf32>
    %23 = vector.shape_cast %8 : vector<16x32xf32> to vector<2x8x4x8xf32>
    %24 = vector.shape_cast %15 : vector<16x32xf32> to vector<2x8x4x8xf32>
    %25 = vector.shape_cast %22 : vector<16x32xf32> to vector<2x8x4x8xf32>
    %26 = vector.extract_strided_slice %23 {offsets = [0, 0, 0, 0], sizes = [1, 8, 4, 8], strides = [1, 1, 1, 1]} : vector<2x8x4x8xf32> to vector<1x8x4x8xf32>
    %27 = vector.shape_cast %26 : vector<1x8x4x8xf32> to vector<8x4x8xf32>
    %28 = vector.extract_strided_slice %24 {offsets = [0, 0, 0, 0], sizes = [1, 8, 4, 8], strides = [1, 1, 1, 1]} : vector<2x8x4x8xf32> to vector<1x8x4x8xf32>
    %29 = vector.shape_cast %28 : vector<1x8x4x8xf32> to vector<8x4x8xf32>
    "tpu.trace_start"() <{level = 10 : i32, message = "qhd,khd->hqk"}> : () -> ()
    %cst_19 = arith.constant dense<0.000000e+00> : vector<4x8x8xf32>
    %30 = tpu.matmul %27, %29, %cst_19 {dimension_numbers = #tpu.dot_dimension_numbers<[2], [2], [0], [0], [0, 1, 0, 0, 1, 0], [1], [1]>} : vector<8x4x8xf32>, vector<8x4x8xf32>, vector<4x8x8xf32> -> vector<4x8x8xf32>
    "tpu.trace_stop"() : () -> ()
    %cst_20 = arith.constant 0.353553385 : f32
    %31 = vector.broadcast %cst_20 : f32 to vector<4x8x8xf32>
    %32 = arith.mulf %30, %31 : vector<4x8x8xf32>
    %cst_21 = arith.constant dense<0xFF800000> : vector<4x8xf32>
    %33 = vector.multi_reduction <maximumf>, %32, %cst_21 [2] : vector<4x8x8xf32> to vector<4x8xf32>
    %34 = vector.shape_cast %33 : vector<4x8xf32> to vector<4x8x1xf32>
    %35 = vector.broadcast %34 : vector<4x8x1xf32> to vector<4x8x8xf32>
    %36 = arith.subf %32, %35 : vector<4x8x8xf32>
    %37 = math.exp %36 : vector<4x8x8xf32>
    %cst_22 = arith.constant dense<0.000000e+00> : vector<4x8xf32>
    %38 = vector.multi_reduction <add>, %37, %cst_22 [2] : vector<4x8x8xf32> to vector<4x8xf32>
    %39 = vector.shape_cast %38 : vector<4x8xf32> to vector<4x8x1xf32>
    %40 = tpu.reciprocal %39 {approx = true} : vector<4x8x1xf32> -> vector<4x8x1xf32>
    %41 = vector.broadcast %40 : vector<4x8x1xf32> to vector<4x8x8xf32>
    %42 = arith.mulf %37, %41 : vector<4x8x8xf32>
    %43 = vector.extract_strided_slice %25 {offsets = [0, 0, 0, 0], sizes = [1, 8, 4, 8], strides = [1, 1, 1, 1]} : vector<2x8x4x8xf32> to vector<1x8x4x8xf32>
    %44 = vector.shape_cast %43 : vector<1x8x4x8xf32> to vector<8x4x8xf32>
    "tpu.trace_start"() <{level = 10 : i32, message = "hqk,khd->qhd"}> : () -> ()
    %cst_23 = arith.constant dense<0.000000e+00> : vector<4x8x8xf32>
    %45 = tpu.matmul %44, %42, %cst_23 {dimension_numbers = #tpu.dot_dimension_numbers<[0], [2], [2], [1], [0, 1, 0, 2, 1, 1], [1], [0]>} : vector<8x4x8xf32>, vector<4x8x8xf32>, vector<4x8x8xf32> -> vector<4x8x8xf32>
    %46 = tpu.transpose %45, [2, 0, 1] : vector<4x8x8xf32> -> vector<8x4x8xf32>
    "tpu.trace_stop"() : () -> ()
    %47 = vector.shape_cast %46 : vector<8x4x8xf32> to vector<8x32xf32>
    %48 = vector.extract_strided_slice %23 {offsets = [1, 0, 0, 0], sizes = [1, 8, 4, 8], strides = [1, 1, 1, 1]} : vector<2x8x4x8xf32> to vector<1x8x4x8xf32>
    %49 = vector.shape_cast %48 : vector<1x8x4x8xf32> to vector<8x4x8xf32>
    %50 = vector.extract_strided_slice %24 {offsets = [1, 0, 0, 0], sizes = [1, 8, 4, 8], strides = [1, 1, 1, 1]} : vector<2x8x4x8xf32> to vector<1x8x4x8xf32>
    %51 = vector.shape_cast %50 : vector<1x8x4x8xf32> to vector<8x4x8xf32>
    "tpu.trace_start"() <{level = 10 : i32, message = "qhd,khd->hqk"}> : () -> ()
    %cst_24 = arith.constant dense<0.000000e+00> : vector<4x8x8xf32>
    %52 = tpu.matmul %49, %51, %cst_24 {dimension_numbers = #tpu.dot_dimension_numbers<[2], [2], [0], [0], [0, 1, 0, 0, 1, 0], [1], [1]>} : vector<8x4x8xf32>, vector<8x4x8xf32>, vector<4x8x8xf32> -> vector<4x8x8xf32>
    "tpu.trace_stop"() : () -> ()
    %cst_25 = arith.constant 0.353553385 : f32
    %53 = vector.broadcast %cst_25 : f32 to vector<4x8x8xf32>
    %54 = arith.mulf %52, %53 : vector<4x8x8xf32>
    %cst_26 = arith.constant dense<0xFF800000> : vector<4x8xf32>
    %55 = vector.multi_reduction <maximumf>, %54, %cst_26 [2] : vector<4x8x8xf32> to vector<4x8xf32>
    %56 = vector.shape_cast %55 : vector<4x8xf32> to vector<4x8x1xf32>
    %57 = vector.broadcast %56 : vector<4x8x1xf32> to vector<4x8x8xf32>
    %58 = arith.subf %54, %57 : vector<4x8x8xf32>
    %59 = math.exp %58 : vector<4x8x8xf32>
    %cst_27 = arith.constant dense<0.000000e+00> : vector<4x8xf32>
    %60 = vector.multi_reduction <add>, %59, %cst_27 [2] : vector<4x8x8xf32> to vector<4x8xf32>
    %61 = vector.shape_cast %60 : vector<4x8xf32> to vector<4x8x1xf32>
    %62 = tpu.reciprocal %61 {approx = true} : vector<4x8x1xf32> -> vector<4x8x1xf32>
    %63 = vector.broadcast %62 : vector<4x8x1xf32> to vector<4x8x8xf32>
    %64 = arith.mulf %59, %63 : vector<4x8x8xf32>
    %65 = vector.extract_strided_slice %25 {offsets = [1, 0, 0, 0], sizes = [1, 8, 4, 8], strides = [1, 1, 1, 1]} : vector<2x8x4x8xf32> to vector<1x8x4x8xf32>
    %66 = vector.shape_cast %65 : vector<1x8x4x8xf32> to vector<8x4x8xf32>
    "tpu.trace_start"() <{level = 10 : i32, message = "hqk,khd->qhd"}> : () -> ()
    %cst_28 = arith.constant dense<0.000000e+00> : vector<4x8x8xf32>
    %67 = tpu.matmul %66, %64, %cst_28 {dimension_numbers = #tpu.dot_dimension_numbers<[0], [2], [2], [1], [0, 1, 0, 2, 1, 1], [1], [0]>} : vector<8x4x8xf32>, vector<4x8x8xf32>, vector<4x8x8xf32> -> vector<4x8x8xf32>
    %68 = tpu.transpose %67, [2, 0, 1] : vector<4x8x8xf32> -> vector<8x4x8xf32>
    "tpu.trace_stop"() : () -> ()
    %69 = vector.shape_cast %68 : vector<8x4x8xf32> to vector<8x32xf32>
    %70 = tpu.concatenate %47, %69 in 0 : vector<8x32xf32>, vector<8x32xf32> -> vector<16x32xf32>
    %71 = arith.addf %70, %8 : vector<16x32xf32>
    %cst_29 = arith.constant dense<0.000000e+00> : vector<16xf32>
    %72 = vector.multi_reduction <add>, %71, %cst_29 [1] : vector<16x32xf32> to vector<16xf32>
    %73 = vector.shape_cast %72 : vector<16xf32> to vector<16x1xf32>
    %cst_30 = arith.constant 3.125000e-02 : f32
    %74 = vector.broadcast %cst_30 : f32 to vector<16x1xf32>
    %75 = arith.mulf %73, %74 : vector<16x1xf32>
    %76 = vector.broadcast %75 : vector<16x1xf32> to vector<16x32xf32>
    %77 = arith.subf %71, %76 : vector<16x32xf32>
    %78 = arith.mulf %77, %77 : vector<16x32xf32>
    %cst_31 = arith.constant dense<0.000000e+00> : vector<16xf32>
    %79 = vector.multi_reduction <add>, %78, %cst_31 [1] : vector<16x32xf32> to vector<16xf32>
    %80 = vector.shape_cast %79 : vector<16xf32> to vector<16x1xf32>
    %cst_32 = arith.constant 3.125000e-02 : f32
    %81 = vector.broadcast %cst_32 : f32 to vector<16x1xf32>
    %82 = arith.mulf %80, %81 : vector<16x1xf32>
    %cst_33 = arith.constant 9.99999974E-6 : f32
    %83 = vector.broadcast %cst_33 : f32 to vector<16x1xf32>
    %84 = arith.addf %82, %83 : vector<16x1xf32>
    %85 = math.rsqrt %84 : vector<16x1xf32>
    %86 = vector.broadcast %85 : vector<16x1xf32> to vector<16x32xf32>
    %87 = arith.mulf %77, %86 : vector<16x32xf32>
    %c0_34 = arith.constant 0 : index
    %c0_35 = arith.constant 0 : index
    %88 = vector.load %arg8[%c0_34, %c0_35] : memref<1x32xf32, #tpu.memory_space<vmem>>, vector<1x32xf32>
    %89 = vector.broadcast %88 : vector<1x32xf32> to vector<16x32xf32>
    %90 = arith.mulf %87, %89 : vector<16x32xf32>
    %c0_36 = arith.constant 0 : index
    %c0_37 = arith.constant 0 : index
    %91 = vector.load %arg9[%c0_36, %c0_37] : memref<1x32xf32, #tpu.memory_space<vmem>>, vector<1x32xf32>
    %92 = vector.broadcast %91 : vector<1x32xf32> to vector<16x32xf32>
    %93 = arith.addf %90, %92 : vector<16x32xf32>
    %c0_38 = arith.constant 0 : index
    %c0_39 = arith.constant 0 : index
    %94 = vector.load %arg10[%c0_38, %c0_39] : memref<32x64xf32, #tpu.memory_space<vmem>>, vector<32x64xf32>
    %cst_40 = arith.constant dense<0.000000e+00> : vector<16x64xf32>
    %95 = tpu.matmul %93, %94, %cst_40 {dimension_numbers = #tpu.dot_dimension_numbers<[1], [0], [0], [1], [0, 0, 1, 1], [], []>} : vector<16x32xf32>, vector<32x64xf32>, vector<16x64xf32> -> vector<16x64xf32>
    %c0_41 = arith.constant 0 : index
    %c0_42 = arith.constant 0 : index
    %96 = vector.load %arg11[%c0_41, %c0_42] : memref<1x64xf32, #tpu.memory_space<vmem>>, vector<1x64xf32>
    %97 = vector.broadcast %96 : vector<1x64xf32> to vector<16x64xf32>
    %98 = arith.addf %95, %97 : vector<16x64xf32>
    %cst_43 = arith.constant 0.000000e+00 : f32
    %99 = vector.broadcast %cst_43 : f32 to vector<16x64xf32>
    %100 = arith.maximumf %98, %99 : vector<16x64xf32>
    %c0_44 = arith.constant 0 : index
    %c0_45 = arith.constant 0 : index
    %101 = vector.load %arg12[%c0_44, %c0_45] : memref<64x32xf32, #tpu.memory_space<vmem>>, vector<64x32xf32>
    %cst_46 = arith.constant dense<0.000000e+00> : vector<16x32xf32>
    %102 = tpu.matmul %100, %101, %cst_46 {dimension_numbers = #tpu.dot_dimension_numbers<[1], [0], [0], [1], [0, 0, 1, 1], [], []>} : vector<16x64xf32>, vector<64x32xf32>, vector<16x32xf32> -> vector<16x32xf32>
    %c0_47 = arith.constant 0 : index
    %c0_48 = arith.constant 0 : index
    %103 = vector.load %arg13[%c0_47, %c0_48] : memref<1x32xf32, #tpu.memory_space<vmem>>, vector<1x32xf32>
    %104 = vector.broadcast %103 : vector<1x32xf32> to vector<16x32xf32>
    %105 = arith.addf %102, %104 : vector<16x32xf32>
    %106 = arith.addf %105, %93 : vector<16x32xf32>
    %cst_49 = arith.constant dense<0.000000e+00> : vector<16xf32>
    %107 = vector.multi_reduction <add>, %106, %cst_49 [1] : vector<16x32xf32> to vector<16xf32>
    %108 = vector.shape_cast %107 : vector<16xf32> to vector<16x1xf32>
    %cst_50 = arith.constant 3.125000e-02 : f32
    %109 = vector.broadcast %cst_50 : f32 to vector<16x1xf32>
    %110 = arith.mulf %108, %109 : vector<16x1xf32>
    %111 = vector.broadcast %110 : vector<16x1xf32> to vector<16x32xf32>
    %112 = arith.subf %106, %111 : vector<16x32xf32>
    %113 = arith.mulf %112, %112 : vector<16x32xf32>
    %cst_51 = arith.constant dense<0.000000e+00> : vector<16xf32>
    %114 = vector.multi_reduction <add>, %113, %cst_51 [1] : vector<16x32xf32> to vector<16xf32>
    %115 = vector.shape_cast %114 : vector<16xf32> to vector<16x1xf32>
    %cst_52 = arith.constant 3.125000e-02 : f32
    %116 = vector.broadcast %cst_52 : f32 to vector<16x1xf32>
    %117 = arith.mulf %115, %116 : vector<16x1xf32>
    %cst_53 = arith.constant 9.99999974E-6 : f32
    %118 = vector.broadcast %cst_53 : f32 to vector<16x1xf32>
    %119 = arith.addf %117, %118 : vector<16x1xf32>
    %120 = math.rsqrt %119 : vector<16x1xf32>
    %121 = vector.broadcast %120 : vector<16x1xf32> to vector<16x32xf32>
    %122 = arith.mulf %112, %121 : vector<16x32xf32>
    %c0_54 = arith.constant 0 : index
    %c0_55 = arith.constant 0 : index
    %123 = vector.load %arg14[%c0_54, %c0_55] : memref<1x32xf32, #tpu.memory_space<vmem>>, vector<1x32xf32>
    %124 = vector.broadcast %123 : vector<1x32xf32> to vector<16x32xf32>
    %125 = arith.mulf %122, %124 : vector<16x32xf32>
    %c0_56 = arith.constant 0 : index
    %c0_57 = arith.constant 0 : index
    %126 = vector.load %arg15[%c0_56, %c0_57] : memref<1x32xf32, #tpu.memory_space<vmem>>, vector<1x32xf32>
    %127 = vector.broadcast %126 : vector<1x32xf32> to vector<16x32xf32>
    %128 = arith.addf %125, %127 : vector<16x32xf32>
    %129 = vector.shape_cast %128 : vector<16x32xf32> to vector<2x8x32xf32>
    %c0_58 = arith.constant 0 : index
    %c0_59 = arith.constant 0 : index
    %c0_60 = arith.constant 0 : index
    %130 = vector.load %arg16[%c0_58, %c0_59, %c0_60] : memref<2x8x32xf32, #tpu.memory_space<vmem>>, vector<2x8x32xf32>
    tpu.vector_store %arg16[%c0_58, %c0_59, %c0_60], %129 {strides = array<i32>} : memref<2x8x32xf32, #tpu.memory_space<vmem>>, vector<2x8x32xf32>,
    return
  }
  func.func @transform_0(%arg0: i32) -> (i32, i32, i32) {
    %c0_i32 = arith.constant 0 : i32
    %c0_i32_0 = arith.constant 0 : i32
    %c0_i32_1 = arith.constant 0 : i32
    return %arg0, %c0_i32, %c0_i32_0 : i32, i32, i32
  }
  func.func @transform_1(%arg0: i32) -> (i32, i32) {
    %c0_i32 = arith.constant 0 : i32
    %c0_i32_0 = arith.constant 0 : i32
    %c0_i32_1 = arith.constant 0 : i32
    return %c0_i32, %c0_i32_0 : i32, i32
  }
  func.func @transform_2(%arg0: i32) -> (i32, i32) {
    %c0_i32 = arith.constant 0 : i32
    %c0_i32_0 = arith.constant 0 : i32
    %c0_i32_1 = arith.constant 0 : i32
    return %c0_i32, %c0_i32_0 : i32, i32
  }
  func.func @transform_3(%arg0: i32) -> (i32, i32) {
    %c0_i32 = arith.constant 0 : i32
    %c0_i32_0 = arith.constant 0 : i32
    %c0_i32_1 = arith.constant 0 : i32
    return %c0_i32, %c0_i32_0 : i32, i32
  }
  func.func @transform_4(%arg0: i32) -> (i32, i32) {
    %c0_i32 = arith.constant 0 : i32
    %c0_i32_0 = arith.constant 0 : i32
    %c0_i32_1 = arith.constant 0 : i32
    return %c0_i32, %c0_i32_0 : i32, i32
  }
  func.func @transform_5(%arg0: i32) -> (i32, i32) {
    %c0_i32 = arith.constant 0 : i32
    %c0_i32_0 = arith.constant 0 : i32
    %c0_i32_1 = arith.constant 0 : i32
    return %c0_i32, %c0_i32_0 : i32, i32
  }
  func.func @transform_6(%arg0: i32) -> (i32, i32) {
    %c0_i32 = arith.constant 0 : i32
    %c0_i32_0 = arith.constant 0 : i32
    %c0_i32_1 = arith.constant 0 : i32
    return %c0_i32, %c0_i32_0 : i32, i32
  }
  func.func @transform_7(%arg0: i32) -> (i32, i32) {
    %c0_i32 = arith.constant 0 : i32
    %c0_i32_0 = arith.constant 0 : i32
    %c0_i32_1 = arith.constant 0 : i32
    return %c0_i32, %c0_i32_0 : i32, i32
  }
  func.func @transform_8(%arg0: i32) -> (i32, i32) {
    %c0_i32 = arith.constant 0 : i32
    %c0_i32_0 = arith.constant 0 : i32
    %c0_i32_1 = arith.constant 0 : i32
    return %c0_i32, %c0_i32_0 : i32, i32
  }
  func.func @transform_9(%arg0: i32) -> (i32, i32) {
    %c0_i32 = arith.constant 0 : i32
    %c0_i32_0 = arith.constant 0 : i32
    %c0_i32_1 = arith.constant 0 : i32
    return %c0_i32, %c0_i32_0 : i32, i32
  }
  func.func @transform_10(%arg0: i32) -> (i32, i32) {
    %c0_i32 = arith.constant 0 : i32
    %c0_i32_0 = arith.constant 0 : i32
    %c0_i32_1 = arith.constant 0 : i32
    return %c0_i32, %c0_i32_0 : i32, i32
  }
  func.func @transform_11(%arg0: i32) -> (i32, i32) {
    %c0_i32 = arith.constant 0 : i32
    %c0_i32_0 = arith.constant 0 : i32
    %c0_i32_1 = arith.constant 0 : i32
    return %c0_i32, %c0_i32_0 : i32, i32
  }
  func.func @transform_12(%arg0: i32) -> (i32, i32) {
    %c0_i32 = arith.constant 0 : i32
    %c0_i32_0 = arith.constant 0 : i32
    %c0_i32_1 = arith.constant 0 : i32
    return %c0_i32, %c0_i32_0 : i32, i32
  }
  func.func @transform_13(%arg0: i32) -> (i32, i32) {
    %c0_i32 = arith.constant 0 : i32
    %c0_i32_0 = arith.constant 0 : i32
    %c0_i32_1 = arith.constant 0 : i32
    return %c0_i32, %c0_i32_0 : i32, i32
  }
  func.func @transform_14(%arg0: i32) -> (i32, i32) {
    %c0_i32 = arith.constant 0 : i32
    %c0_i32_0 = arith.constant 0 : i32
    %c0_i32_1 = arith.constant 0 : i32
    return %c0_i32, %c0_i32_0 : i32, i32
  }
  func.func @transform_15(%arg0: i32) -> (i32, i32, i32) {
    %c0_i32 = arith.constant 0 : i32
    %c0_i32_0 = arith.constant 0 : i32
    %c0_i32_1 = arith.constant 0 : i32
    return %arg0, %c0_i32, %c0_i32_0 : i32, i32, i32
  }
}

</mosaic_0001>

<bundles_post_ra>
// kernel: tpu_custom_call.1
= control target key start
LH: loop header
LB: loop body
LE: loop exit
PB: predicated region body
PF: predicated region fallthrough
CT: control target
= control target key end

     0   :  { %20 = vsyncpa [#allocation3], 0  ;;  %s7159_s0 = inlined_call_operand.hbm [shape: f32[2,8,32], index: 0, kind: input, shape index: {}]   ;;  %s7160_s1 = inlined_call_operand.vmem [shape: f32[32,32], index: 1, kind: input, shape index: {}]   ;;  %s7161_s2 = inlined_call_operand.vmem [shape: f32[1,32], index: 2, kind: input, shape index: {}]   ;;  %s7162_s3 = inlined_call_operand.vmem [shape: f32[32,32], index: 3, kind: input, shape index: {}]   ;;  %s7163_s4 = inlined_call_operand.vmem [shape: f32[1,32], index: 4, kind: input, shape index: {}]   ;;  %s7164_s5 = inlined_call_operand.vmem [shape: f32[32,32], index: 5, kind: input, shape index: {}]   ;;  %s7165_s6 = inlined_call_operand.vmem [shape: f32[1,32], index: 6, kind: input, shape index: {}]   ;;  %s7166_s7 = inlined_call_operand.vmem [shape: f32[1,32], index: 7, kind: input, shape index: {}]   ;;  %s7167_s8 = inlined_call_operand.vmem [shape: f32[1,32], index: 8, kind: input, shape index: {}]   ;;  %s7168_s9 = inlined_call_operand.hbm [shape: f32[32,64], index: 9, kind: input, shape index: {}]   ;;  %s7169_s10 = inlined_call_operand.vmem [shape: f32[1,64], index: 10, kind: input, shape index: {}]   ;;  %s7170_s11 = inlined_call_operand.vmem [shape: f32[64,32], index: 11, kind: input, shape index: {}]   ;;  %s7171_s12 = inlined_call_operand.vmem [shape: f32[1,32], index: 12, kind: input, shape index: {}]   ;;  %s7172_s13 = inlined_call_operand.vmem [shape: f32[1,32], index: 13, kind: input, shape index: {}]   ;;  %s7173_s14 = inlined_call_operand.vmem [shape: f32[1,32], index: 14, kind: input, shape index: {}]   ;;  %s7174_s15 = inlined_call_operand.hbm [shape: f32[2,8,32], index: 15, kind: output, shape index: {}]  }
   0x1   :  { %21 = vsyncpa [#allocation6], 0 }
   0x2   :  { %22 = vsyncpa [#allocation4], 0  ;;  %s6406_s18 = smov [#allocation2]   ;;  %s6334_s22 = scalar_lea.hbm %s7159_s0, 256 }
   0x3   :  { %s28_s19 = sshll.u32 %s6406_s18, 4  ;;  %p6335_p0 = scmp.ne.s32.totalorder %s7159_s0, %s6334_s22  ;;  %s29_s19 = int_to_ptr.vmem [resolvable:$true] %s28_s19 }
   0x4   :  { %p6338_p1 = scmp.lt.u32.totalorder %s6334_s22, %s7159_s0 }
   0x6   :  { %p6340_p2 = pnand %p6338_p1, %p6335_p0 }
   0x8   :  { %6343 = shalt.err (!%p6340_p2)
}
   0x9   :  { %s6344_s27 = scalar_lea.vmem %s29_s19, 256  ;;  %p6349_p4 = scmp.lt.s32.totalorder %s29_s19, %s29_s19 }
   0xa   :  { %p6345_p3 = scmp.ne.s32.totalorder %s29_s19, %s6344_s27  ;;  %p6350_p5 = scmp.lt.s32.totalorder %s6344_s27, %s6344_s27 }
   0xc   :  { %p6351_p6 = por %p6350_p5, %p6349_p4 }
   0xe   :  { %p6352_p7 = pnand %p6351_p6, %p6345_p3 }
  0x10   :  { %6355 = shalt.err (!%p6352_p7)
}
  0x11   :  { %s6407_s28 = smov 128   ;;  %s6408_s29 = smov 8  }
  0x12   :  { %34 = dma.hbm_to_vmem [thread:$0]  %s7159_s0, 256, %s29_s19, [#allocation3], %s6407_s28, %s6407_s28, %s6408_s29  }
  0x13   :  { %s6409_s17 = smov [#allocation5]   ;;  %s6356_s22 = scalar_lea.hbm %s7168_s9, 512 }
  0x14   :  { %s56_s18 = sshll.u32 %s6409_s17, 4  ;;  %p6357_p8 = scmp.ne.s32.totalorder %s7168_s9, %s6356_s22  ;;  %s57_s18 = int_to_ptr.vmem [resolvable:$true] %s56_s18 }
  0x15   :  { %p6360_p9 = scmp.lt.u32.totalorder %s6356_s22, %s7168_s9 }
  0x17   :  { %p6362_p10 = pnand %p6360_p9, %p6357_p8 }
  0x19   :  { %6365 = shalt.err (!%p6362_p10)
}
  0x1a   :  { %s6366_s27 = scalar_lea.vmem %s57_s18, 512  ;;  %p6371_p12 = scmp.lt.s32.totalorder %s57_s18, %s57_s18 }
  0x1b   :  { %p6367_p11 = scmp.ne.s32.totalorder %s57_s18, %s6366_s27  ;;  %p6372_p13 = scmp.lt.s32.totalorder %s6366_s27, %s6366_s27 }
  0x1d   :  { %p6373_p0 = por %p6372_p13, %p6371_p12 }
  0x1f   :  { %p6374_p1 = pnand %p6373_p0, %p6367_p11 }
  0x21   :  { %6377 = shalt.err (!%p6374_p1)
}
  0x22   :  { %62 = dma.hbm_to_vmem [thread:$0]  %s7168_s9, 512, %s57_s18, [#allocation6], %s6407_s28, %s6407_s28, %s6408_s29  }
  0x23   :  { %6400 = dma.done.wait [#allocation3], 256  }
  0x24   :  { %6401 = vsyncadd [#allocation3], 4294967040 }
  0x25   :  { %6402 = dma.done.wait [#allocation6], 512  }
  0x26   :  { %6403 = vsyncadd [#allocation6], 4294966784  ;;  %vm92_vm0 = vcmask 261120   ;;  %v176_v0 = vld [vmem:[%s7162_s3] sm:$0xff]  ;;  %v177_v1 = vld [vmem:[%s7162_s3 + $0x8] sm:$0xff]  ;;  %v6410_v31 = vmov 0.0   ;;  %v377_v35 = vlaneseq }
  0x27   :  { %v178_v2 = vld [vmem:[%s7162_s3 + $0x10] sm:$0xff]  ;;  %v6240_v3 = vpack.c.bf16 %v177_v1, %v176_v0  ;;  %v179_v4 = vld [vmem:[%s7162_s3 + $0x18] sm:$0xff]  ;;  %v79_v5 = vld [vmem:[#allocation2] sm:$0xff]  ;;  %v6414_v33 = vmov 1983009808   ;;  %vm6416_vm1 = vmmov 0  }
  0x28   :  { %v6244_v6 = vpack.c.bf16 %v179_v4, %v178_v2  ;;  %6108 = vmatprep.mubr.msk.f32.mxu1 %vm92_vm0, %v79_v5  ;;  %v81_v7 = vld [vmem:[%s7160_s1] sm:$0xff]  ;;  %v82_v8 = vld [vmem:[%s7160_s1 + $0x8] sm:$0xff]  ;;  %v83_v9 = vld [vmem:[%s7160_s1 + $0x10] sm:$0xff]  ;;  %6097 = vmatprep.mubr.msk.f32.mxu0 %vm92_vm0, %v79_v5  ;;  %v375_v34 = vunpack.c.l.s4 %v6414_v33  ;;  %v378_v37 = vshrl.u32 %v377_v35, 7  ;;  %v6415_v38 = vmov 1934713408  }
  0x29   :  { %6241 = vmatprep.subr.bf16.mxu1 %v6240_v3  ;;  %v6232_v10 = vpack.c.bf16 %v82_v8, %v81_v7  ;;  %v84_v11 = vld [vmem:[%s7160_s1 + $0x18] sm:$0xff]  ;;  %v80_v13 = vld [vmem:[#allocation2 + $0x8] sm:$0xff]  ;;  %v264_v14 = vld [vmem:[%s7164_s5] sm:$0xff]  ;;  %v407_v39 = vunpack.c.l.s4 %v6415_v38  ;;  %vm1604_vm2 = vcmask 64512   ;;  %s6418_s0 = smov 24   ;;  %vm3242_vm3 = vcmask 130048  }
  0x2a   :  { %6243 = vmatpush3.bf16.msra.mxu1 %v6240_v3  ;;  %v6236_v12 = vpack.c.bf16 %v84_v11, %v83_v9  ;;  %v265_v15 = vld [vmem:[%s7164_s5 + $0x8] sm:$0xff]  ;;  %v266_v17 = vld [vmem:[%s7164_s5 + $0x10] sm:$0xff]  ;;  %v267_v18 = vld [vmem:[%s7164_s5 + $0x18] sm:$0xff]  ;;  %s6412_s5 = smov 120   ;;  %v376_v36 = vunpack.c.0.s8 %v375_v34  ;;  %vm3244_vm4 = vcmask 195584   ;;  %vm5824_vm5 = vcmask 523264  }
  0x2b   :  { %6245 = vmatprep.subr.bf16.mxu1 %v6244_v6  ;;  %6233 = vmatprep.subr.bf16.mxu0 %v6232_v10  ;;  %v6248_v16 = vpack.c.bf16 %v265_v15, %v264_v14  ;;  %v6252_v19 = vpack.c.bf16 %v267_v18, %v266_v17  ;;  %v5975_v20 = vld [vmem:[%s7163_s4] ss:$0 sm:$0xff]  ;;  %s6411_s4 = smov 104   ;;  %v408_v44 = vunpack.c.0.s8 %v407_v39  ;;  %s6419_s30 = smov [#allocation7]  }
  0x2c   :  { %6235 = vmatpush3.bf16.msra.mxu0 %v6232_v10  ;;  %v5972_v24 = vld [vmem:[%s7161_s2] ss:$0 sm:$0xff]  ;;  %s6413_s2 = smov 112   ;;  %v6591_v43 = vsub.s32 %v376_v36, %v378_v37  ;;  %s5959_s16 = sshll.u32 %s6419_s30, 4  ;;  %s5960_s16 = int_to_ptr.vmem [resolvable:$true] %s5959_s16 }
  0x2d   :  { %6237 = vmatprep.subr.bf16.mxu0 %v6236_v12  ;;  %v6593_v49 = vsub.s32 %v408_v44, %v378_v37  ;;  %v6612_v3 = vld [vmem:[%s7165_s6] ss:$0 sm:$0xff]  ;;  %s6417_s6 = smov 16   ;;  %s6378_s1 = scalar_lea.vmem %s5960_s16, 256 }
  0x2e   :  { %6247 = vmatpush3.bf16.msra.mxu1 %v6244_v6  ;;  %p6379_p2 = scmp.ne.s32.totalorder %s5960_s16, %s6378_s1  ;;  %p6383_p3 = scmp.lt.s32.totalorder %s5960_s16, %s5960_s16 }
  0x2f   :  { %6127 = vmatprep.subr.mxu1 %v6410_v31  ;;  %p6384_p4 = scmp.lt.s32.totalorder %s6378_s1, %s6378_s1 }
  0x30   :  { %6239 = vmatpush3.bf16.msra.mxu0 %v6236_v12 }
  0x31   :  { %6109 = vmatmul.mubr.msk.f32.vlgmr.msra.gmra.mrb[0].mxu1 %vm92_vm0, %v80_v13  ;;  %6249 = vmatprep.subr.bf16.mxu0 %v6248_v16  ;;  %p6385_p5 = por %p6384_p4, %p6383_p3 }
  0x32   :  { %6129 = vmatprep.mubr.msk.f32.mxu1 %vm6416_vm1, %v6410_v31 }
  0x33   :  { %6098 = vmatmul.mubr.msk.f32.vlgmr.msra.gmra.mrb[0].mxu0 %vm92_vm0, %v80_v13  ;;  %p6386_p6 = pnand %p6385_p5, %p6379_p2 }
  0x34   :  { %6119 = vmatprep.mubr.msk.f32.mxu0 %vm92_vm0, %v79_v5  ;;  %6251 = vmatpush3.bf16.msra.mxu0 %v6248_v16 }
  0x35   :  { %6253 = vmatprep.subr.bf16.mxu0 %v6252_v19 }
  0x38   :  { %6255 = vmatpush3.bf16.msra.mxu0 %v6252_v19 }
  0x39   :  { %6122 = vmatprep.subr.mxu0 %v6410_v31 }
  0x3b   :  { %6120 = vmatmul.mubr.msk.f32.vlgmr.msra.gmra.mrb[2].mxu0 %vm92_vm0, %v80_v13 }
  0x3c   :  { %6124 = vmatprep.mubr.msk.f32.mxu0 %vm6416_vm1, %v6410_v31 }
 0x104   :  { %v6110_v21 = vpop.f32.mrb[0].mxu1 }
 0x105   :  { %v6575_v22 = vadd.f32 %v6110_v21, %v5975_v20  ;;  %v253_v23 = vpop.f32.mrb[1].mxu1 }
 0x106   :  { %v254_v25 = vadd.f32 %v5975_v20, %v253_v23  ;;  %v6099_v26 = vpop.f32.mrb[0].mxu0 }
 0x107   :  { %v6580_v27 = vadd.f32 %v6099_v26, %v5972_v24  ;;  %v165_v28 = vpop.f32.mrb[1].mxu0 }
 0x108   :  { %v262_v29 = vmax.f32 %v254_v25, 0.0  ;;  %v166_v30 = vadd.f32 %v5972_v24, %v165_v28 }
 0x10a   :  { %522 = vrot.lane.b32.xlu1 %v262_v29, %s6411_s4  ;;  %510 = vrot.lane.b32.xlu0 %v262_v29, %s6412_s5  ;;  %v6586_v32 = vmax.f32 %v166_v30, 0.0 }
 0x10e   :  { %516 = vrot.lane.b32.xlu0 %v262_v29, %s6413_s2  ;;  %354 = vrot.lane.b32.xlu1 %v6586_v32, %s6412_s5  ;;  %v6121_v2 = vpop.f32.mrb[2].mxu0 }
 0x10f   :  { %v6617_v4 = vadd.f32 %v6121_v2, %v6612_v3  ;;  %v341_v5 = vpop.f32.mrb[3].mxu0 }
 0x17c   :  { %v523_v40 = vpop.permute.xlu1 %522  ;;  %v511_v41 = vpop.permute.xlu0 %510 }
 0x17d   :  { %v544_v42 = vcombine.low %v511_v41, %v523_v40  ;;  %v545_v46 = vcombine.high %v511_v41, %v523_v40 }
 0x17f   :  { %v552_v51 = vrot.slane %v544_v42, %v6591_v43  ;;  %v559_v55 = vrot.slane %v545_v46, %v6591_v43 }
 0x180   :  { %v517_v45 = vpop.permute.xlu0 %516  ;;  %v6619_v6 = vpop.permute.xlu1 %354 }
 0x181   :  { %v528_v47 = vcombine.low %v262_v29, %v517_v45  ;;  %v529_v48 = vcombine.high %v262_v29, %v517_v45 }
 0x183   :  { %v536_v50 = vrot.slane %v528_v47, %v6591_v43  ;;  %v543_v52 = vrot.slane %v529_v48, %v6591_v43 }
 0x185   :  { %v561_v53 = vcombine.high %v536_v50, %v552_v51  ;;  %v560_v54 = vcombine.low %v536_v50, %v552_v51  ;;  %v576_v58 = vcombine.low %v543_v52, %v559_v55  ;;  %v577_v61 = vcombine.high %v543_v52, %v559_v55 }
 0x187   :  { %v575_v56 = vrot.slane %v561_v53, %v6593_v49  ;;  %v568_v57 = vrot.slane %v560_v54, %v6593_v49  ;;  %v584_v60 = vrot.slane %v576_v58, %v6593_v49  ;;  %v591_v63 = vrot.slane %v577_v61, %v6593_v49 }
 0x188   :  { %v342_v61 = vadd.f32 %v6612_v3, %v341_v5 }
 0x189   :  { %952 = vxpose.xlu0.b32.start.end [1/1] (short) (narrow) %v575_v56, 8  ;;  %888 = vxpose.xlu1.b32.start.end [1/1] (short) (narrow) %v568_v57, 8  ;;  %v592_v59 = vcombine.high %v568_v57, %v6410_v31  ;;  %v593_v62 = vcombine.high %v575_v56, %v6410_v31  ;;  %v594_v0 = vcombine.high %v584_v60, %v6410_v31 }
 0x18a   :  { %v595_v1 = vcombine.high %v591_v63, %v6410_v31 }
 0x18d   :  { %920 = vxpose.xlu0.b32.start.end [1/1] (short) (narrow) %v592_v59, 8  ;;  %1016 = vxpose.xlu1.b32.start.end [1/1] (short) (narrow) %v584_v60, 8 }
 0x191   :  { %984 = vxpose.xlu0.b32.start.end [1/1] (short) (narrow) %v593_v62, 8  ;;  %1080 = vxpose.xlu1.b32.start.end [1/1] (short) (narrow) %v591_v63, 8  ;;  %v6642_v62 = vmax.f32 %v342_v61, 0.0  ;;  %v6649_v63 = vmax.f32 %v6575_v22, 0.0 }
 0x195   :  { %1048 = vxpose.xlu0.b32.start.end [1/1] (short) (narrow) %v594_v0, 8 }
 0x199   :  { %1112 = vxpose.xlu0.b32.start.end [1/1] (short) (narrow) %v595_v1, 8 }
 0x1af   :  { %366 = vrot.lane.b32.xlu1 %v6586_v32, %s6411_s4 }
 0x1c2   :  { %360 = vrot.lane.b32.xlu0 %v6586_v32, %s6413_s2 }
 0x209   :  { %v968_v7 = vpop.trf.xlu0  ;;  %v904_v8 = vpop.trf.xlu1 }
 0x20a   :  { %v1144_v15 = vcombine.low %v904_v8, %v968_v7  ;;  %v1145_v29 = vcombine.high %v904_v8, %v968_v7 }
 0x20c   :  { %v1152_v19 = vrot.slane %v1144_v15, %v6591_v43  ;;  %v1159_v40 = vrot.slane %v1145_v29, %v6591_v43 }
 0x20d   :  { %v936_v9 = vpop.trf.xlu0  ;;  %v1032_v10 = vpop.trf.xlu1 }
 0x211   :  { %v1000_v11 = vpop.trf.xlu0  ;;  %v1096_v14 = vpop.trf.xlu1 }
 0x212   :  { %v1160_v12 = vcombine.low %v936_v9, %v1000_v11  ;;  %v1176_v17 = vcombine.low %v1032_v10, %v1096_v14  ;;  %v1161_v23 = vcombine.high %v936_v9, %v1000_v11  ;;  %v1177_v25 = vcombine.high %v1032_v10, %v1096_v14 }
 0x214   :  { %v1168_v16 = vrot.slane %v1160_v12, %v6591_v43  ;;  %v1184_v26 = vrot.slane %v1176_v17, %v6591_v43  ;;  %v1175_v35 = vrot.slane %v1161_v23, %v6591_v43  ;;  %v1191_v36 = vrot.slane %v1177_v25, %v6591_v43 }
 0x215   :  { %v1064_v13 = vpop.trf.xlu0 }
 0x216   :  { %v1208_v24 = vcombine.low %v1152_v19, %v1168_v16  ;;  %v1209_v39 = vcombine.high %v1152_v19, %v1168_v16  ;;  %v1224_v47 = vcombine.low %v1159_v40, %v1175_v35  ;;  %v1225_v54 = vcombine.high %v1159_v40, %v1175_v35 }
 0x218   :  { %v1216_v37 = vrot.slane %v1208_v24, %v6593_v49  ;;  %v1223_v46 = vrot.slane %v1209_v39, %v6593_v49  ;;  %v1232_v53 = vrot.slane %v1224_v47, %v6593_v49  ;;  %v1239_v58 = vrot.slane %v1225_v54, %v6593_v49 }
 0x219   :  { %v1128_v18 = vpop.trf.xlu0 }
 0x21a   :  { %v1192_v20 = vcombine.low %v1064_v13, %v1128_v18  ;;  %v1193_v21 = vcombine.high %v1064_v13, %v1128_v18 }
 0x21c   :  { %v1200_v28 = vrot.slane %v1192_v20, %v6591_v43  ;;  %v1207_v30 = vrot.slane %v1193_v21, %v6591_v43 }
 0x21e   :  { %v1240_v33 = vcombine.low %v1184_v26, %v1200_v28  ;;  %v1241_v34 = vcombine.high %v1184_v26, %v1200_v28  ;;  %v1256_v45 = vcombine.low %v1191_v36, %v1207_v30  ;;  %v1257_v52 = vcombine.high %v1191_v36, %v1207_v30 }
 0x220   :  { %v1248_v38 = vrot.slane %v1240_v33, %v6593_v49  ;;  %v1255_v44 = vrot.slane %v1241_v34, %v6593_v49  ;;  %v1264_v51 = vrot.slane %v1256_v45, %v6593_v49  ;;  %v1271_v57 = vrot.slane %v1257_v52, %v6593_v49 }
 0x221   :  { %v367_v1 = vpop.permute.xlu1 %366 }
 0x222   :  { %v1273_v41 = vcombine.high %v1216_v37, %v1248_v38  ;;  %v1272_v42 = vcombine.low %v1216_v37, %v1248_v38  ;;  %v1274_v48 = vcombine.low %v1223_v46, %v1255_v44  ;;  %v1275_v50 = vcombine.high %v1223_v46, %v1255_v44 }
 0x223   :  { %v1276_v55 = vcombine.low %v1232_v53, %v1264_v51  ;;  %v1277_v56 = vcombine.high %v1232_v53, %v1264_v51  ;;  %v1278_v59 = vcombine.low %v1239_v58, %v1271_v57  ;;  %v1279_v60 = vcombine.high %v1239_v58, %v1271_v57 }
 0x224   :  { %1312 = vxpose.xlu0.b32.start.end [1/1] (short) (narrow) %v1273_v41, 8  ;;  %1280 = vxpose.xlu1.b32.start.end [1/1] (short) (narrow) %v1272_v42, 8  ;;  %v388_v22 = vcombine.low %v6619_v6, %v367_v1  ;;  %v389_v5 = vcombine.high %v6619_v6, %v367_v1 }
 0x226   :  { %v396_v9 = vrot.slane %v388_v22, %v6591_v43  ;;  %v403_v10 = vrot.slane %v389_v5, %v6591_v43 }
 0x228   :  { %1344 = vxpose.xlu0.b32.start.end [1/1] (short) (narrow) %v1274_v48, 8  ;;  %1376 = vxpose.xlu1.b32.start.end [1/1] (short) (narrow) %v1275_v50, 8 }
 0x22c   :  { %1408 = vxpose.xlu0.b32.start.end [1/1] (short) (narrow) %v1276_v55, 8  ;;  %1440 = vxpose.xlu1.b32.start.end [1/1] (short) (narrow) %v1277_v56, 8 }
 0x230   :  { %1472 = vxpose.xlu0.b32.start.end [1/1] (short) (narrow) %v1278_v59, 8  ;;  %1504 = vxpose.xlu1.b32.start.end [1/1] (short) (narrow) %v1279_v60, 8 }
 0x234   :  { %v361_v0 = vpop.permute.xlu0 %360 }
 0x235   :  { %v372_v2 = vcombine.low %v6586_v32, %v361_v0  ;;  %v373_v3 = vcombine.high %v6586_v32, %v361_v0 }
 0x237   :  { %v380_v7 = vrot.slane %v372_v2, %v6591_v43  ;;  %v387_v8 = vrot.slane %v373_v3, %v6591_v43 }
 0x239   :  { %v404_v11 = vcombine.low %v380_v7, %v396_v9  ;;  %v405_v12 = vcombine.high %v380_v7, %v396_v9  ;;  %v420_v13 = vcombine.low %v387_v8, %v403_v10  ;;  %v421_v14 = vcombine.high %v387_v8, %v403_v10 }
 0x23b   :  { %v412_v17 = vrot.slane %v404_v11, %v6593_v49  ;;  %v419_v18 = vrot.slane %v405_v12, %v6593_v49  ;;  %v428_v6 = vrot.slane %v420_v13, %v6593_v49  ;;  %v435_v19 = vrot.slane %v421_v14, %v6593_v49 }
 0x23d   :  { %v820_v25 = vcombine.low %v412_v17, %v419_v18  ;;  %v5981_v26 = vcombine.high %v412_v17, %v419_v18  ;;  %v836_v28 = vcombine.low %v428_v6, %v435_v19  ;;  %v5982_v29 = vcombine.high %v428_v6, %v435_v19 }
 0x23f   :  { %v827_v36 = vrot.slane %v820_v25, %v6591_v43  ;;  %v835_v37 = vrot.slane %v5981_v26, %v6591_v43  ;;  %v843_v38 = vrot.slane %v836_v28, %v6591_v43  ;;  %v851_v39 = vrot.slane %v5982_v29, %v6591_v43 }
 0x241   :  { %v852_v46 = vcombine.low %v827_v36, %v835_v37  ;;  %v868_v47 = vcombine.low %v843_v38, %v851_v39  ;;  %v853_v52 = vcombine.high %v827_v36, %v835_v37  ;;  %v869_v56 = vcombine.high %v843_v38, %v851_v39 }
 0x243   :  { %v860_v58 = vrot.slane %v852_v46, %v6593_v49  ;;  %v876_v59 = vrot.slane %v868_v47, %v6593_v49  ;;  %v867_v2 = vrot.slane %v853_v52, %v6593_v49  ;;  %v883_v7 = vrot.slane %v869_v56, %v6593_v49 }
 0x245   :  { %v884_v3 = vcombine.low %v860_v58, %v876_v59  ;;  %v885_v22 = vcombine.high %v860_v58, %v876_v59  ;;  %v886_v9 = vcombine.low %v867_v2, %v883_v7  ;;  %v887_v10 = vcombine.high %v867_v2, %v883_v7 }
 0x24e   :  { %666 = vrot.lane.b32.xlu1 %v6642_v62, %s6412_s5 }
 0x252   :  { %678 = vrot.lane.b32.xlu1 %v6642_v62, %s6411_s4 }
 0x256   :  { %512 = vrot.lane.b32.xlu1 %v6649_v63, %s6412_s5 }
 0x259   :  { %672 = vrot.lane.b32.xlu0 %v6642_v62, %s6413_s2 }
 0x25a   :  { %524 = vrot.lane.b32.xlu1 %v6649_v63, %s6411_s4 }
 0x25d   :  { %518 = vrot.lane.b32.xlu0 %v6649_v63, %s6413_s2 }
 0x2a4   :  { %v1328_v15 = vpop.trf.xlu0  ;;  %v1296_v16 = vpop.trf.xlu1 }
 0x2a8   :  { %v1360_v20 = vpop.trf.xlu0  ;;  %v1392_v21 = vpop.trf.xlu1 }
 0x2a9   :  { %v1536_v23 = vcombine.low %v1296_v16, %v1360_v20  ;;  %v1544_v24 = vcombine.low %v1328_v15, %v1392_v21 }
 0x2ab   :  { %v1543_v34 = vrot.slane %v1536_v23, %v6591_v43  ;;  %v1551_v35 = vrot.slane %v1544_v24, %v6591_v43 }
 0x2ac   :  { %v1424_v30 = vpop.trf.xlu0  ;;  %v1456_v33 = vpop.trf.xlu1 }
 0x2ad   :  { %v1568_v42 = vcombine.low %v1543_v34, %v1551_v35  ;;  %v1569_v48 = vcombine.high %v1543_v34, %v1551_v35 }
 0x2af   :  { %v1576_v53 = vrot.slane %v1568_v42, %v6593_v49  ;;  %v1583_v57 = vrot.slane %v1569_v48, %v6593_v49 }
 0x2b0   :  { %v1488_v40 = vpop.trf.xlu0  ;;  %v1520_v41 = vpop.trf.xlu1 }
 0x2b1   :  { %v1552_v44 = vcombine.low %v1424_v30, %v1488_v40  ;;  %v1560_v45 = vcombine.low %v1456_v33, %v1520_v41 }
 0x2b3   :  { %v1559_v50 = vrot.slane %v1552_v44, %v6591_v43  ;;  %v1567_v51 = vrot.slane %v1560_v45, %v6591_v43 }
 0x2b5   :  { %v1584_v54 = vcombine.low %v1559_v50, %v1567_v51  ;;  %v1585_v55 = vcombine.high %v1559_v50, %v1567_v51 }
 0x2b7   :  { %v1592_v60 = vrot.slane %v1584_v54, %v6593_v49  ;;  %v1599_v61 = vrot.slane %v1585_v55, %v6593_v49 }
 0x2b9   :  { %v1600_v0 = vcombine.low %v1576_v53, %v1592_v60  ;;  %v1601_v1 = vcombine.high %v1576_v53, %v1592_v60  ;;  %v1602_v5 = vcombine.low %v1583_v57, %v1599_v61  ;;  %v1603_v8 = vcombine.high %v1583_v57, %v1599_v61 }
 0x2bb   :  { %6123 = vmatpush3.msra.mxu0 %v1600_v0  ;;  %6128 = vmatpush3.msra.mxu1 %v1601_v1 }
 0x2bc   :  { %6125 = vmatmul.mubr.msk.f32.vlgmr.msra.gmra.mrb[4].mxu0 %vm1604_vm2, %v884_v3  ;;  %6130 = vmatmul.mubr.msk.f32.vlgmr.msra.gmra.mrb[2].mxu1 %vm1604_vm2, %v885_v22 }
 0x2bd   :  { %6132 = vmatprep.subr.mxu0 %v6410_v31  ;;  %6137 = vmatprep.subr.mxu1 %v6410_v31 }
 0x2be   :  { %6133 = vmatpush3.msra.mxu0 %v1602_v5  ;;  %6134 = vmatprep.mubr.msk.f32.mxu0 %vm6416_vm1, %v6410_v31 }
 0x2bf   :  { %6138 = vmatpush3.msra.mxu1 %v1603_v8  ;;  %6139 = vmatprep.mubr.msk.f32.mxu1 %vm6416_vm1, %v6410_v31 }
 0x2c0   :  { %6135 = vmatmul.mubr.msk.f32.vlgmr.msra.gmra.mrb[6].mxu0 %vm1604_vm2, %v886_v9  ;;  %6140 = vmatmul.mubr.msk.f32.vlgmr.msra.gmra.mrb[4].mxu1 %vm1604_vm2, %v887_v10  ;;  %v667_v11 = vpop.permute.xlu1 %666 }
 0x2c1   :  { %6147 = vmatprep.subr.mxu1 %v6410_v31  ;;  %6149 = vmatprep.mubr.msk.f32.mxu1 %vm6416_vm1, %v6410_v31 }
 0x2c2   :  { %6142 = vmatprep.subr.mxu0 %v6410_v31  ;;  %6144 = vmatprep.mubr.msk.f32.mxu0 %vm6416_vm1, %v6410_v31 }
 0x2c4   :  { %v679_v12 = vpop.permute.xlu1 %678 }
 0x2c5   :  { %v700_v13 = vcombine.low %v667_v11, %v679_v12  ;;  %v701_v14 = vcombine.high %v667_v11, %v679_v12 }
 0x2c7   :  { %v708_v6 = vrot.slane %v700_v13, %v6591_v43  ;;  %v715_v21 = vrot.slane %v701_v14, %v6591_v43 }
 0x2c8   :  { %v513_v18 = vpop.permute.xlu1 %512 }
 0x2cb   :  { %v673_v15 = vpop.permute.xlu0 %672 }
 0x2cc   :  { %v684_v16 = vcombine.low %v6642_v62, %v673_v15  ;;  %v685_v17 = vcombine.high %v6642_v62, %v673_v15  ;;  %v525_v29 = vpop.permute.xlu1 %524 }
 0x2cd   :  { %v612_v35 = vcombine.low %v513_v18, %v525_v29  ;;  %v613_v41 = vcombine.high %v513_v18, %v525_v29 }
 0x2ce   :  { %v692_v19 = vrot.slane %v684_v16, %v6591_v43  ;;  %v699_v20 = vrot.slane %v685_v17, %v6591_v43 }
 0x2cf   :  { %v519_v24 = vpop.permute.xlu0 %518  ;;  %v620_v42 = vrot.slane %v612_v35, %v6591_v43  ;;  %v627_v48 = vrot.slane %v613_v41, %v6591_v43 }
 0x2d0   :  { %v716_v23 = vcombine.low %v692_v19, %v708_v6  ;;  %v732_v25 = vcombine.low %v699_v20, %v715_v21  ;;  %v717_v28 = vcombine.high %v692_v19, %v708_v6  ;;  %v596_v30 = vcombine.low %v6649_v63, %v519_v24 }
 0x2d1   :  { %v733_v34 = vcombine.high %v699_v20, %v715_v21  ;;  %v597_v37 = vcombine.high %v6649_v63, %v519_v24 }
 0x2d2   :  { %v724_v26 = vrot.slane %v716_v23, %v6593_v49  ;;  %v740_v33 = vrot.slane %v732_v25, %v6593_v49  ;;  %v731_v36 = vrot.slane %v717_v28, %v6593_v49  ;;  %v604_v38 = vrot.slane %v596_v30, %v6591_v43 }
 0x2d3   :  { %v747_v40 = vrot.slane %v733_v34, %v6593_v49  ;;  %v611_v45 = vrot.slane %v597_v37, %v6591_v43 }
 0x2d4   :  { %1945 = vxpose.xlu0.b32.start.end [1/1] (short) (narrow) %v724_v26, 8  ;;  %v748_v62 = vcombine.high %v724_v26, %v6410_v31  ;;  %v750_v39 = vcombine.high %v740_v33, %v6410_v31  ;;  %v749_v44 = vcombine.high %v731_v36, %v6410_v31  ;;  %v628_v47 = vcombine.low %v604_v38, %v620_v42 }
 0x2d5   :  { %v751_v46 = vcombine.high %v747_v40, %v6410_v31  ;;  %v629_v63 = vcombine.high %v604_v38, %v620_v42  ;;  %v644_v52 = vcombine.low %v611_v45, %v627_v48  ;;  %v645_v55 = vcombine.high %v611_v45, %v627_v48 }
 0x2d6   :  { %1977 = vxpose.xlu1.b32.start.end [1/1] (short) (narrow) %v748_v62, 8  ;;  %v636_v50 = vrot.slane %v628_v47, %v6593_v49 }
 0x2d7   :  { %v643_v51 = vrot.slane %v629_v63, %v6593_v49  ;;  %v652_v54 = vrot.slane %v644_v52, %v6593_v49  ;;  %v659_v58 = vrot.slane %v645_v55, %v6593_v49 }
 0x2d8   :  { %2009 = vxpose.xlu0.b32.start.end [1/1] (short) (narrow) %v731_v36, 8  ;;  %v660_v56 = vcombine.high %v636_v50, %v6410_v31 }
 0x2d9   :  { %v661_v53 = vcombine.high %v643_v51, %v6410_v31  ;;  %v662_v57 = vcombine.high %v652_v54, %v6410_v31  ;;  %v663_v59 = vcombine.high %v659_v58, %v6410_v31 }
 0x2da   :  { %2105 = vxpose.xlu1.b32.start.end [1/1] (short) (narrow) %v750_v39, 8 }
 0x2dc   :  { %2041 = vxpose.xlu0.b32.start.end [1/1] (short) (narrow) %v749_v44, 8 }
 0x2de   :  { %2169 = vxpose.xlu1.b32.start.end [1/1] (short) (narrow) %v751_v46, 8 }
 0x2e0   :  { %2073 = vxpose.xlu0.b32.start.end [1/1] (short) (narrow) %v740_v33, 8 }
 0x2e2   :  { %3314 = vxpose.xlu1.b32.start.end [1/1] (short) (narrow) %v636_v50, 8 }
 0x2e4   :  { %2137 = vxpose.xlu0.b32.start.end [1/1] (short) (narrow) %v747_v40, 8 }
 0x2e6   :  { %3410 = vxpose.xlu1.b32.start.end [1/1] (short) (narrow) %v661_v53, 8 }
 0x2e8   :  { %3346 = vxpose.xlu0.b32.start.end [1/1] (short) (narrow) %v660_v56, 8 }
 0x2ea   :  { %3474 = vxpose.xlu1.b32.start.end [1/1] (short) (narrow) %v662_v57, 8 }
 0x2ec   :  { %3378 = vxpose.xlu0.b32.start.end [1/1] (short) (narrow) %v643_v51, 8 }
 0x2ee   :  { %3538 = vxpose.xlu1.b32.start.end [1/1] (short) (narrow) %v663_v59, 8 }
 0x2f0   :  { %3442 = vxpose.xlu0.b32.start.end [1/1] (short) (narrow) %v652_v54, 8 }
 0x2f4   :  { %3506 = vxpose.xlu0.b32.start.end [1/1] (short) (narrow) %v659_v58, 8 }
 0x354   :  { %v6731_v60 = vpop.trf.xlu0 }
 0x356   :  { %v1993_v61 = vpop.trf.xlu1 }
 0x358   :  { %v6733_v0 = vpop.trf.xlu0 }
 0x359   :  { %v2201_v23 = vcombine.low %v6731_v60, %v6733_v0  ;;  %v2202_v35 = vcombine.high %v6731_v60, %v6733_v0 }
 0x35a   :  { %v6735_v1 = vpop.trf.xlu1 }
 0x35b   :  { %v2209_v38 = vrot.slane %v2201_v23, %v6591_v43 }
 0x35c   :  { %v2057_v2 = vpop.trf.xlu0 }
 0x35d   :  { %v2217_v24 = vcombine.low %v1993_v61, %v2057_v2  ;;  %v2218_v30 = vcombine.high %v1993_v61, %v2057_v2 }
 0x35e   :  { %v6737_v3 = vpop.trf.xlu1 }
 0x35f   :  { %v2249_v25 = vcombine.low %v6735_v1, %v6737_v3  ;;  %v2225_v39 = vrot.slane %v2217_v24, %v6591_v43  ;;  %v2232_v47 = vrot.slane %v2218_v30, %v6591_v43  ;;  %v2250_v55 = vcombine.high %v6735_v1, %v6737_v3 }
 0x360   :  { %v2089_v22 = vpop.trf.xlu0 }
 0x361   :  { %v2257_v40 = vrot.slane %v2249_v25, %v6591_v43  ;;  %v2265_v57 = vcombine.low %v2209_v38, %v2225_v39 }
 0x362   :  { %v3330_v5 = vpop.trf.xlu1 }
 0x364   :  { %v2153_v7 = vpop.trf.xlu0 }
 0x365   :  { %v2233_v17 = vcombine.low %v2089_v22, %v2153_v7  ;;  %v2234_v63 = vcombine.high %v2089_v22, %v2153_v7 }
 0x366   :  { %v3426_v8 = vpop.trf.xlu1 }
 0x367   :  { %v2241_v62 = vrot.slane %v2233_v17, %v6591_v43  ;;  %v2248_v2 = vrot.slane %v2234_v63, %v6591_v43  ;;  %v2216_v17 = vrot.slane %v2202_v35, %v6591_v43 }
 0x368   :  { %v3362_v9 = vpop.trf.xlu0 }
 0x369   :  { %v3587_v10 = vcombine.high %v3362_v9, %v3426_v8  ;;  %v3586_v18 = vcombine.low %v3362_v9, %v3426_v8  ;;  %v2297_v48 = vcombine.low %v2241_v62, %v2257_v40  ;;  %v2298_v3 = vcombine.high %v2241_v62, %v2257_v40 }
 0x36a   :  { %v3490_v11 = vpop.trf.xlu1  ;;  %v2281_v23 = vcombine.low %v2216_v17, %v2232_v47  ;;  %v2282_v30 = vcombine.high %v2216_v17, %v2232_v47 }
 0x36b   :  { %v3601_v15 = vrot.slane %v3587_v10, %v6591_v43  ;;  %v3594_v33 = vrot.slane %v3586_v18, %v6591_v43  ;;  %v2305_v8 = vrot.slane %v2297_v48, %v6593_v49 }
 0x36c   :  { %v3394_v12 = vpop.trf.xlu0  ;;  %v2296_v35 = vrot.slane %v2282_v30, %v6593_v49 }
 0x36d   :  { %v3571_v13 = vcombine.high %v3330_v5, %v3394_v12  ;;  %v3570_v14 = vcombine.low %v3330_v5, %v3394_v12 }
 0x36e   :  { %v3554_v19 = vpop.trf.xlu1 }
 0x36f   :  { %v3585_v16 = vrot.slane %v3571_v13, %v6591_v43  ;;  %v3578_v26 = vrot.slane %v3570_v14, %v6591_v43  ;;  %v3618_v28 = vcombine.low %v3490_v11, %v3554_v19  ;;  %v3619_v29 = vcombine.high %v3490_v11, %v3554_v19 }
 0x370   :  { %v3458_v6 = vpop.trf.xlu0  ;;  %v2264_v14 = vrot.slane %v2250_v55, %v6591_v43  ;;  %v2312_v19 = vrot.slane %v2298_v3, %v6593_v49 }
 0x371   :  { %v3650_v20 = vcombine.low %v3585_v16, %v3601_v15  ;;  %v3651_v21 = vcombine.high %v3585_v16, %v3601_v15  ;;  %v3634_v41 = vcombine.low %v3578_v26, %v3594_v33  ;;  %v3626_v42 = vrot.slane %v3618_v28, %v6591_v43 }
 0x372   :  { %v3633_v44 = vrot.slane %v3619_v29, %v6591_v43  ;;  %v3635_v50 = vcombine.high %v3578_v26, %v3594_v33  ;;  %v2273_v15 = vrot.slane %v2265_v57, %v6593_v49  ;;  %v2266_v16 = vcombine.high %v2209_v38, %v2225_v39 }
 0x373   :  { %v3642_v56 = vrot.slane %v3634_v41, %v6593_v49  ;;  %v6762_v58 = vrot.slane %v3650_v20, %v6593_v49  ;;  %v6779_v22 = vrot.slane %v3651_v21, %v6593_v49  ;;  %v2313_v20 = vcombine.low %v2248_v2, %v2264_v14 }
 0x374   :  { %v3522_v34 = vpop.trf.xlu0  ;;  %v6776_v1 = vrot.slane %v3635_v50, %v6593_v49  ;;  %v2330_v18 = vcombine.high %v2273_v15, %v2305_v8  ;;  %v2280_v21 = vrot.slane %v2266_v16, %v6593_v49  ;;  %v2329_v25 = vcombine.low %v2273_v15, %v2305_v8 }
 0x375   :  { %v3602_v36 = vcombine.low %v3458_v6, %v3522_v34  ;;  %v3603_v37 = vcombine.high %v3458_v6, %v3522_v34  ;;  %v2321_v26 = vrot.slane %v2313_v20, %v6593_v49  ;;  %v2314_v28 = vcombine.high %v2248_v2, %v2264_v14 }
 0x376   :  { %v2331_v24 = vcombine.low %v2280_v21, %v2312_v19  ;;  %v2289_v29 = vrot.slane %v2281_v23, %v6593_v49  ;;  %v2332_v62 = vcombine.high %v2280_v21, %v2312_v19 }
 0x377   :  { %v3610_v45 = vrot.slane %v3602_v36, %v6591_v43  ;;  %v3617_v46 = vrot.slane %v3603_v37, %v6591_v43  ;;  %v2328_v34 = vrot.slane %v2314_v28, %v6593_v49 }
 0x378   :  { %v2333_v33 = vcombine.low %v2289_v29, %v2321_v26  ;;  %v2334_v36 = vcombine.high %v2289_v29, %v2321_v26 }
 0x379   :  { %v3682_v51 = vcombine.low %v3617_v46, %v3633_v44  ;;  %v3683_v52 = vcombine.high %v3617_v46, %v3633_v44  ;;  %v3666_v53 = vcombine.low %v3610_v45, %v3626_v42  ;;  %v3667_v54 = vcombine.high %v3610_v45, %v3626_v42 }
 0x37a   :  { %v2335_v37 = vcombine.low %v2296_v35, %v2328_v34  ;;  %v2336_v42 = vcombine.high %v2296_v35, %v2328_v34 }
 0x37b   :  { %v3674_v59 = vrot.slane %v3666_v53, %v6593_v49  ;;  %v6766_v60 = vrot.slane %v3667_v54, %v6593_v49  ;;  %v6769_v61 = vrot.slane %v3682_v51, %v6593_v49  ;;  %v6772_v0 = vrot.slane %v3683_v52, %v6593_v49 }
 0x37d   :  { %v3699_v5 = vcombine.high %v3642_v56, %v3674_v59  ;;  %v3698_v7 = vcombine.low %v3642_v56, %v3674_v59  ;;  %v3702_v9 = vcombine.low %v6762_v58, %v6769_v61  ;;  %v3701_v10 = vcombine.high %v6776_v1, %v6766_v60 }
 0x37e   :  { %v3704_v11 = vcombine.low %v6779_v22, %v6772_v0  ;;  %v3703_v12 = vcombine.high %v6762_v58, %v6769_v61  ;;  %v3705_v13 = vcombine.high %v6779_v22, %v6772_v0  ;;  %v3700_v6 = vcombine.low %v6776_v1, %v6766_v60 }
 0x37f   :  { %3738 = vxpose.xlu0.b32.start.end [1/1] (short) (narrow) %v3699_v5, 8  ;;  %3706 = vxpose.xlu1.b32.start.end [1/1] (short) (narrow) %v3698_v7, 8  ;;  %v6816_v7 = vmax.f32 %v6580_v27, 0.0 }
 0x383   :  { %2369 = vxpose.xlu0.b32.start.end [1/1] (short) (narrow) %v2330_v18, 8  ;;  %3770 = vxpose.xlu1.b32.start.end [1/1] (short) (narrow) %v3700_v6, 8 }
 0x387   :  { %2401 = vxpose.xlu0.b32.start.end [1/1] (short) (narrow) %v2331_v24, 8  ;;  %2337 = vxpose.xlu1.b32.start.end [1/1] (short) (narrow) %v2329_v25, 8 }
 0x38b   :  { %2433 = vxpose.xlu0.b32.start.end [1/1] (short) (narrow) %v2332_v62, 8  ;;  %2465 = vxpose.xlu1.b32.start.end [1/1] (short) (narrow) %v2333_v33, 8 }
 0x38f   :  { %v1674_v38 = vpop.f32.mrb[4].mxu0  ;;  %v1747_v39 = vpop.f32.mrb[2].mxu1  ;;  %2497 = vxpose.xlu0.b32.start.end [1/1] (short) (narrow) %v2334_v36, 8  ;;  %2529 = vxpose.xlu1.b32.start.end [1/1] (short) (narrow) %v2335_v37, 8 }
 0x390   :  { %v6126_v40 = vpop.f32.mrb[5].mxu0  ;;  %v6131_v41 = vpop.f32.mrb[3].mxu1  ;;  %v1898_v63 = vmul.f32 0.35355338, %v1747_v39  ;;  %v1897_v52 = vmul.f32 0.35355338, %v1674_v38 }
 0x392   :  { %v1904_v50 = vsel %vm1604_vm2, %v1898_v63, -inf  ;;  %v1901_v54 = vsel %vm1604_vm2, %v1897_v52, -inf }
 0x393   :  { %v1820_v44 = vpop.f32.mrb[6].mxu0  ;;  %v1893_v45 = vpop.f32.mrb[4].mxu1  ;;  %2561 = vxpose.xlu0.b32.start.end [1/1] (short) (narrow) %v2336_v42, 8 }
 0x394   :  { %v6136_v46 = vpop.f32.mrb[7].mxu0  ;;  %v6141_v47 = vpop.f32.mrb[5].mxu1  ;;  %v1899_v48 = vmul.f32 0.35355338, %v1820_v44  ;;  %v1900_v53 = vmul.f32 0.35355338, %v1893_v45 }
 0x396   :  { %v1907_v51 = vsel %vm1604_vm2, %v1899_v48, -inf  ;;  %v1910_v55 = vsel %vm1604_vm2, %v1900_v53, -inf }
 0x3b6   :  { %1905 = vmax.xlane.f32.xlu1 %v1904_v50 }
 0x3ba   :  { %1908 = vmax.xlane.f32.xlu1 %v1907_v51 }
 0x3c0   :  { %1902 = vmax.xlane.f32.xlu0 %v1901_v54 }
 0x3c4   :  { %1911 = vmax.xlane.f32.xlu0 %v1910_v55 }
 0x3ed   :  { %3834 = vxpose.xlu1.b32.start.end [1/1] (short) (narrow) %v3702_v9, 8 }
 0x3f1   :  { %3802 = vxpose.xlu0.b32.start.end [1/1] (short) (narrow) %v3701_v10, 8 }
 0x3ff   :  { %v6807_v56 = vpop.trf.xlu0  ;;  %v6809_v57 = vpop.trf.xlu1 }
 0x403   :  { %v2385_v59 = vpop.trf.xlu0  ;;  %v6811_v60 = vpop.trf.xlu1 }
 0x404   :  { %v3962_v2 = vcombine.low %v6809_v57, %v6811_v60 }
 0x407   :  { %v2417_v1 = vpop.trf.xlu0  ;;  %v2353_v3 = vpop.trf.xlu1 }
 0x408   :  { %v2593_v5 = vcombine.low %v2353_v3, %v2417_v1 }
 0x40a   :  { %v2600_v14 = vrot.slane %v2593_v5, %v6591_v43 }
 0x40b   :  { %362 = vrot.lane.b32.xlu1 %v6816_v7, %s6413_s2  ;;  %v2449_v8 = vpop.trf.xlu0  ;;  %v2481_v9 = vpop.trf.xlu1 }
 0x40c   :  { %v2601_v10 = vcombine.low %v2385_v59, %v2449_v8 }
 0x40e   :  { %v2608_v15 = vrot.slane %v2601_v10, %v6591_v43 }
 0x40f   :  { %368 = vrot.lane.b32.xlu1 %v6816_v7, %s6411_s4  ;;  %v2513_v16 = vpop.trf.xlu0  ;;  %v2545_v17 = vpop.trf.xlu1 }
 0x410   :  { %v2625_v18 = vcombine.low %v2600_v14, %v2608_v15  ;;  %v2626_v6 = vcombine.high %v2600_v14, %v2608_v15  ;;  %v2609_v19 = vcombine.low %v2481_v9, %v2545_v17 }
 0x412   :  { %v2616_v21 = vrot.slane %v2609_v19, %v6591_v43  ;;  %v6827_v24 = vrot.slane %v2625_v18, %v6593_v49  ;;  %v6830_v25 = vrot.slane %v2626_v6, %v6593_v49 }
 0x413   :  { %v2577_v27 = vpop.trf.xlu0 }
 0x414   :  { %v2617_v20 = vcombine.low %v2513_v16, %v2577_v27 }
 0x416   :  { %v2624_v23 = vrot.slane %v2617_v20, %v6591_v43 }
 0x418   :  { %v2641_v26 = vcombine.low %v2616_v21, %v2624_v23  ;;  %v2642_v28 = vcombine.high %v2616_v21, %v2624_v23 }
 0x41a   :  { %356 = vrot.lane.b32.xlu0 %v6816_v7, %s6412_s5  ;;  %v6835_v29 = vrot.slane %v2641_v26, %v6593_v49  ;;  %v6838_v30 = vrot.slane %v2642_v28, %v6593_v49 }
 0x41c   :  { %v2657_v62 = vcombine.low %v6827_v24, %v6835_v29  ;;  %v2658_v33 = vcombine.high %v6827_v24, %v6835_v29  ;;  %v2659_v34 = vcombine.low %v6830_v25, %v6838_v30  ;;  %v2660_v35 = vcombine.high %v6830_v25, %v6838_v30 }
 0x443   :  { %v1906_v36 = vpop.xlane.xlu1 %1905 }
 0x444   :  { %v1914_v37 = vsub.f32 %v1898_v63, %v1906_v36 }
 0x446   :  { %v1919_v38 = vmul.f32 1.442695, %v1914_v37 }
 0x447   :  { %v1909_v39 = vpop.xlane.xlu1 %1908 }
 0x448   :  { %6294 = vpow2.f32 %v1919_v38  ;;  %v1915_v40 = vsub.f32 %v1899_v48, %v1909_v39 }
 0x44a   :  { %v1921_v41 = vmul.f32 1.442695, %v1915_v40 }
 0x44c   :  { %6296 = vpow2.f32 %v1921_v41 }
 0x44d   :  { %v1903_v42 = vpop.xlane.xlu0 %1902 }
 0x44e   :  { %v1913_v44 = vsub.f32 %v1897_v52, %v1903_v42 }
 0x450   :  { %v1917_v45 = vmul.f32 1.442695, %v1913_v44 }
 0x451   :  { %v1912_v46 = vpop.xlane.xlu0 %1911 }
 0x452   :  { %v6295_v47 = vpop.eup %6294  ;;  %6298 = vpow2.f32 %v1917_v45  ;;  %v1916_v50 = vsub.f32 %v1900_v53, %v1912_v46  ;;  %v6862_v53 = vmax.f32 %v6617_v4, 0.0 }
 0x453   :  { %v1928_v51 = vsel %vm1604_vm2, %v6295_v47, 0.0 }
 0x454   :  { %v1923_v54 = vmul.f32 1.442695, %v1916_v50  ;;  %1929 = vadd.xlane.f32.xlu1 %v1928_v51 }
 0x456   :  { %v6297_v55 = vpop.eup %6296  ;;  %6300 = vpow2.f32 %v1923_v54 }
 0x457   :  { %v1931_v63 = vsel %vm1604_vm2, %v6297_v55, 0.0 }
 0x458   :  { %1932 = vadd.xlane.f32.xlu1 %v1931_v63 }
 0x45c   :  { %v6299_v59 = vpop.eup %6298 }
 0x45d   :  { %v1925_v48 = vsel %vm1604_vm2, %v6299_v59, 0.0 }
 0x45e   :  { %1926 = vadd.xlane.f32.xlu0 %v1925_v48 }
 0x460   :  { %v6301_v1 = vpop.eup %6300 }
 0x461   :  { %v1934_v52 = vsel %vm1604_vm2, %v6301_v1, 0.0 }
 0x462   :  { %1935 = vadd.xlane.f32.xlu0 %v1934_v52 }
 0x471   :  { %v3818_v0 = vpop.trf.xlu0 }
 0x472   :  { %v3970_v39 = vcombine.low %v6807_v56, %v3818_v0  ;;  %v3969_v56 = vrot.slane %v3962_v2, %v6591_v43 }
 0x48b   :  { %3898 = vxpose.xlu1.b32.start.end [1/1] (short) (narrow) %v3704_v11, 8  ;;  %v6870_v11 = vpop.trf.xlu1 }
 0x48c   :  { %v357_v22 = vpop.permute.xlu0 %356 }
 0x48f   :  { %3866 = vxpose.xlu0.b32.start.end [1/1] (short) (narrow) %v3703_v12, 8  ;;  %v363_v58 = vpop.permute.xlu1 %362 }
 0x490   :  { %v440_v19 = vcombine.low %v6816_v7, %v363_v58  ;;  %v441_v27 = vcombine.high %v6816_v7, %v363_v58 }
 0x492   :  { %v448_v23 = vrot.slane %v440_v19, %v6591_v43  ;;  %v455_v24 = vrot.slane %v441_v27, %v6591_v43 }
 0x493   :  { %3930 = vxpose.xlu0.b32.start.end [1/1] (short) (narrow) %v3705_v13, 8  ;;  %v369_v61 = vpop.permute.xlu1 %368 }
 0x494   :  { %v456_v18 = vcombine.low %v357_v22, %v369_v61  ;;  %v457_v6 = vcombine.high %v357_v22, %v369_v61 }
 0x496   :  { %v464_v20 = vrot.slane %v456_v18, %v6591_v43  ;;  %v471_v21 = vrot.slane %v457_v6, %v6591_v43 }
 0x498   :  { %v472_v26 = vcombine.low %v448_v23, %v464_v20  ;;  %v473_v28 = vcombine.high %v448_v23, %v464_v20  ;;  %v488_v29 = vcombine.low %v455_v24, %v471_v21  ;;  %v489_v25 = vcombine.high %v455_v24, %v471_v21 }
 0x49a   :  { %v480_v30 = vrot.slane %v472_v26, %v6593_v49 }
 0x4a9   :  { %674 = vrot.lane.b32.xlu1 %v6862_v53, %s6413_s2 }
 0x4ad   :  { %680 = vrot.lane.b32.xlu1 %v6862_v53, %s6411_s4 }
 0x4bc   :  { %668 = vrot.lane.b32.xlu0 %v6862_v53, %s6412_s5 }
 0x4e1   :  { %v1930_v12 = vpop.xlane.xlu1 %1929 }
 0x4e2   :  { %6302 = vrcp.f32 %v1930_v12 }
 0x4e5   :  { %v1933_v13 = vpop.xlane.xlu1 %1932 }
 0x4eb   :  { %v1927_v4 = vpop.xlane.xlu0 %1926 }
 0x4ec   :  { %v6303_v3 = vpop.eup %6302  ;;  %6304 = vrcp.f32 %v1927_v4 }
 0x4ed   :  { %v1942_v5 = vmul.f32 %v6303_v3, %v6295_v47  ;;  %6306 = vrcp.f32 %v1933_v13  ;;  %v3977_v47 = vrot.slane %v3970_v39, %v6591_v43 }
 0x4ef   :  { %v1936_v8 = vpop.xlane.xlu0 %1935  ;;  %6148 = vmatpush3.xpose.msk.msra.mxu1 %vm1604_vm2, %v1942_v5  ;;  %v3995_v52 = vcombine.high %v3969_v56, %v3977_v47 }
 0x4f0   :  { %6308 = vrcp.f32 %v1936_v8  ;;  %6157 = vmatprep.subr.mxu1 %v6410_v31 }
 0x4f1   :  { %v4009_v13 = vrot.slane %v3995_v52, %v6593_v49 }
 0x4f2   :  { %6150 = vmatmul.mubr.msk.f32.vlgmr.msra.gmra.mrb[6].mxu1 %vm1604_vm2, %v2658_v33  ;;  %v496_v33 = vrot.slane %v488_v29, %v6593_v49 }
 0x4f3   :  { %6159 = vmatprep.mubr.msk.f32.mxu1 %vm6416_vm1, %v6410_v31 }
 0x4f6   :  { %v6305_v9 = vpop.eup %6304 }
 0x4f7   :  { %v1941_v10 = vmul.f32 %v6305_v9, %v6299_v59  ;;  %v6307_v14 = vpop.eup %6306  ;;  %v3994_v59 = vcombine.low %v3969_v56, %v3977_v47 }
 0x4f8   :  { %v1943_v16 = vmul.f32 %v6307_v14, %v6297_v55 }
 0x4f9   :  { %6143 = vmatpush3.xpose.msk.msra.mxu0 %vm1604_vm2, %v1941_v10  ;;  %v4002_v57 = vrot.slane %v3994_v59, %v6593_v49 }
 0x4fa   :  { %v6309_v15 = vpop.eup %6308  ;;  %6152 = vmatprep.subr.mxu0 %v6410_v31 }
 0x4fb   :  { %v1944_v17 = vmul.f32 %v6309_v15, %v6301_v1 }
 0x4fc   :  { %6145 = vmatmul.mubr.msk.f32.vlgmr.msra.gmra.mrb[8].mxu0 %vm1604_vm2, %v2657_v62  ;;  %v487_v62 = vrot.slane %v473_v28, %v6593_v49 }
 0x4fd   :  { %6153 = vmatpush3.xpose.msk.msra.mxu0 %vm1604_vm2, %v1943_v16  ;;  %6158 = vmatpush3.xpose.msk.msra.mxu1 %vm1604_vm2, %v1944_v17 }
 0x4fe   :  { %6154 = vmatprep.mubr.msk.f32.mxu0 %vm6416_vm1, %v6410_v31  ;;  %6162 = vmatprep.subr.mxu0 %v6410_v31  ;;  %v5997_v36 = vcombine.high %v480_v30, %v487_v62 }
 0x4ff   :  { %6167 = vmatprep.subr.mxu1 %v6410_v31 }
 0x500   :  { %6155 = vmatmul.mubr.msk.f32.vlgmr.msra.gmra.mrb[10].mxu0 %vm1604_vm2, %v2659_v34  ;;  %6160 = vmatmul.mubr.msk.f32.vlgmr.msra.gmra.mrb[8].mxu1 %vm1604_vm2, %v2660_v35  ;;  %v503_v34 = vrot.slane %v489_v25, %v6593_v49  ;;  %v3246_v35 = vcombine.low %v480_v30, %v487_v62  ;;  %v3261_v44 = vrot.slane %v5997_v36, %v6591_v43 }
 0x501   :  { %6164 = vmatprep.mubr.msk.f32.mxu0 %vm6416_vm1, %v6410_v31  ;;  %6169 = vmatprep.mubr.msk.f32.mxu1 %vm6416_vm1, %v6410_v31 }
 0x502   :  { %v3262_v37 = vcombine.low %v496_v33, %v503_v34  ;;  %v5998_v38 = vcombine.high %v496_v33, %v503_v34  ;;  %v3253_v42 = vrot.slane %v3246_v35, %v6591_v43 }
 0x504   :  { %v3269_v45 = vrot.slane %v3262_v37, %v6591_v43  ;;  %v3277_v46 = vrot.slane %v5998_v38, %v6591_v43  ;;  %v3278_v55 = vcombine.low %v3253_v42, %v3261_v44  ;;  %v3279_v12 = vcombine.high %v3253_v42, %v3261_v44 }
 0x506   :  { %v3294_v63 = vcombine.low %v3269_v45, %v3277_v46  ;;  %v3295_v0 = vcombine.high %v3269_v45, %v3277_v46  ;;  %v3293_v9 = vrot.slane %v3279_v12, %v6593_v49 }
 0x508   :  { %v3302_v22 = vrot.slane %v3294_v63, %v6593_v49  ;;  %v3309_v10 = vrot.slane %v3295_v0, %v6593_v49 }
 0x50a   :  { %v3312_v16 = vcombine.low %v3293_v9, %v3309_v10  ;;  %v3313_v17 = vcombine.high %v3293_v9, %v3309_v10 }
 0x50b   :  { %v3914_v40 = vpop.trf.xlu1 }
 0x50c   :  { %v3978_v50 = vcombine.low %v6870_v11, %v3914_v40  ;;  %v3286_v11 = vrot.slane %v3278_v55, %v6593_v49 }
 0x50e   :  { %v3985_v48 = vrot.slane %v3978_v50, %v6591_v43  ;;  %v3310_v5 = vcombine.low %v3286_v11, %v3302_v22  ;;  %v3311_v8 = vcombine.high %v3286_v11, %v3302_v22 }
 0x50f   :  { %v3882_v41 = vpop.trf.xlu0 }
 0x513   :  { %v3946_v51 = vpop.trf.xlu0 }
 0x514   :  { %v3986_v54 = vcombine.low %v3882_v41, %v3946_v51 }
 0x516   :  { %v3993_v1 = vrot.slane %v3986_v54, %v6591_v43 }
 0x518   :  { %v4010_v58 = vcombine.low %v3985_v48, %v3993_v1  ;;  %v4011_v61 = vcombine.high %v3985_v48, %v3993_v1 }
 0x51a   :  { %v4018_v60 = vrot.slane %v4010_v58, %v6593_v49  ;;  %v4025_v2 = vrot.slane %v4011_v61, %v6593_v49 }
 0x51b   :  { %v675_v18 = vpop.permute.xlu1 %674 }
 0x51c   :  { %v4026_v4 = vcombine.low %v4002_v57, %v4018_v60  ;;  %v4027_v3 = vcombine.high %v4002_v57, %v4018_v60  ;;  %v4028_v14 = vcombine.low %v4009_v13, %v4025_v2  ;;  %v4029_v15 = vcombine.high %v4009_v13, %v4025_v2 }
 0x51d   :  { %v752_v6 = vcombine.low %v6862_v53, %v675_v18  ;;  %v753_v19 = vcombine.high %v6862_v53, %v675_v18 }
 0x51e   :  { %6163 = vmatpush3.msra.mxu0 %v4026_v4  ;;  %6168 = vmatpush3.msra.mxu1 %v4027_v3 }
 0x51f   :  { %6165 = vmatmul.mubr.msk.f32.vlgmr.msra.gmra.mrb[12].mxu0 %vm1604_vm2, %v3310_v5  ;;  %6170 = vmatmul.mubr.msk.f32.vlgmr.msra.gmra.mrb[10].mxu1 %vm1604_vm2, %v3311_v8  ;;  %v681_v27 = vpop.permute.xlu1 %680  ;;  %v760_v24 = vrot.slane %v752_v6, %v6591_v43  ;;  %v767_v26 = vrot.slane %v753_v19, %v6591_v43 }
 0x520   :  { %6172 = vmatprep.subr.mxu0 %v6410_v31  ;;  %6177 = vmatprep.subr.mxu1 %v6410_v31 }
 0x521   :  { %6173 = vmatpush3.msra.mxu0 %v4028_v14  ;;  %6178 = vmatpush3.msra.mxu1 %v4029_v15 }
 0x522   :  { %6174 = vmatprep.mubr.msk.f32.mxu0 %vm6416_vm1, %v6410_v31  ;;  %6179 = vmatprep.mubr.msk.f32.mxu1 %vm6416_vm1, %v6410_v31 }
 0x523   :  { %6175 = vmatmul.mubr.msk.f32.vlgmr.msra.gmra.mrb[14].mxu0 %vm1604_vm2, %v3312_v16  ;;  %6180 = vmatmul.mubr.msk.f32.vlgmr.msra.gmra.mrb[12].mxu1 %vm1604_vm2, %v3313_v17 }
 0x524   :  { %6182 = vmatprep.subr.mxu0 %v6410_v31  ;;  %6187 = vmatprep.subr.mxu1 %v6410_v31 }
 0x525   :  { %6184 = vmatprep.mubr.msk.f32.mxu0 %vm6416_vm1, %v6410_v31  ;;  %6189 = vmatprep.mubr.msk.f32.mxu1 %vm6416_vm1, %v6410_v31 }
 0x52e   :  { %v669_v20 = vpop.permute.xlu0 %668 }
 0x52f   :  { %v768_v21 = vcombine.low %v669_v20, %v681_v27  ;;  %v769_v23 = vcombine.high %v669_v20, %v681_v27 }
 0x531   :  { %v776_v28 = vrot.slane %v768_v21, %v6591_v43  ;;  %v783_v29 = vrot.slane %v769_v23, %v6591_v43 }
 0x533   :  { %v784_v25 = vcombine.low %v760_v24, %v776_v28  ;;  %v800_v30 = vcombine.low %v767_v26, %v783_v29  ;;  %v785_v33 = vcombine.high %v760_v24, %v776_v28  ;;  %v801_v35 = vcombine.high %v767_v26, %v783_v29 }
 0x535   :  { %v792_v62 = vrot.slane %v784_v25, %v6593_v49  ;;  %v808_v34 = vrot.slane %v800_v30, %v6593_v49  ;;  %v799_v36 = vrot.slane %v785_v33, %v6593_v49  ;;  %v815_v38 = vrot.slane %v801_v35, %v6593_v49 }
 0x537   :  { %4370 = vxpose.xlu0.b32.start.end [1/1] (short) (narrow) %v792_v62, 8  ;;  %v816_v53 = vcombine.high %v792_v62, %v6410_v31  ;;  %v818_v37 = vcombine.high %v808_v34, %v6410_v31  ;;  %v817_v39 = vcombine.high %v799_v36, %v6410_v31  ;;  %v819_v40 = vcombine.high %v815_v38, %v6410_v31 }
 0x539   :  { %4402 = vxpose.xlu1.b32.start.end [1/1] (short) (narrow) %v816_v53, 8 }
 0x53b   :  { %4434 = vxpose.xlu0.b32.start.end [1/1] (short) (narrow) %v799_v36, 8 }
 0x53d   :  { %4530 = vxpose.xlu1.b32.start.end [1/1] (short) (narrow) %v818_v37, 8 }
 0x53f   :  { %4466 = vxpose.xlu0.b32.start.end [1/1] (short) (narrow) %v817_v39, 8 }
 0x541   :  { %4594 = vxpose.xlu1.b32.start.end [1/1] (short) (narrow) %v819_v40, 8 }
 0x543   :  { %4498 = vxpose.xlu0.b32.start.end [1/1] (short) (narrow) %v808_v34, 8 }
 0x547   :  { %4562 = vxpose.xlu0.b32.start.end [1/1] (short) (narrow) %v815_v38, 8 }
 0x5b7   :  { %v4386_v41 = vpop.trf.xlu0 }
 0x5b9   :  { %v4418_v42 = vpop.trf.xlu1 }
 0x5bb   :  { %v4450_v44 = vpop.trf.xlu0 }
 0x5bc   :  { %v4627_v45 = vcombine.high %v4386_v41, %v4450_v44  ;;  %v4626_v59 = vcombine.low %v4386_v41, %v4450_v44 }
 0x5bd   :  { %v4546_v46 = vpop.trf.xlu1 }
 0x5be   :  { %v4641_v51 = vrot.slane %v4627_v45, %v6591_v43  ;;  %v4634_v22 = vrot.slane %v4626_v59, %v6591_v43 }
 0x5bf   :  { %v4482_v47 = vpop.trf.xlu0 }
 0x5c0   :  { %v4643_v50 = vcombine.high %v4418_v42, %v4482_v47  ;;  %v4642_v56 = vcombine.low %v4418_v42, %v4482_v47 }
 0x5c1   :  { %v4610_v55 = vpop.trf.xlu1 }
 0x5c2   :  { %v4657_v54 = vrot.slane %v4643_v50, %v6591_v43  ;;  %v4674_v52 = vcombine.low %v4546_v46, %v4610_v55  ;;  %v4650_v61 = vrot.slane %v4642_v56, %v6591_v43  ;;  %v4675_v12 = vcombine.high %v4546_v46, %v4610_v55 }
 0x5c3   :  { %v4514_v63 = vpop.trf.xlu0 }
 0x5c4   :  { %v4706_v48 = vcombine.low %v4641_v51, %v4657_v54  ;;  %v4707_v1 = vcombine.high %v4641_v51, %v4657_v54  ;;  %v4682_v2 = vrot.slane %v4674_v52, %v6591_v43  ;;  %v4689_v13 = vrot.slane %v4675_v12, %v6591_v43 }
 0x5c5   :  { %v6964_v58 = vpop.f32.mrb[6].mxu1  ;;  %v4690_v5 = vcombine.low %v4634_v22, %v4650_v61  ;;  %v4691_v15 = vcombine.high %v4634_v22, %v4650_v61 }
 0x5c6   :  { %v6151_v0 = vpop.f32.mrb[7].mxu1  ;;  %v6979_v19 = vrot.slane %v4707_v1, %v6593_v49  ;;  %v4714_v20 = vrot.slane %v4706_v48, %v6593_v49 }
 0x5c7   :  { %v4578_v11 = vpop.trf.xlu0  ;;  %v4698_v17 = vrot.slane %v4690_v5, %v6593_v49  ;;  %v4705_v62 = vrot.slane %v4691_v15, %v6593_v49 }
 0x5c8   :  { %v4658_v57 = vcombine.low %v4514_v63, %v4578_v11  ;;  %v4659_v60 = vcombine.high %v4514_v63, %v4578_v11 }
 0x5ca   :  { %v4666_v4 = vrot.slane %v4658_v57, %v6591_v43  ;;  %v4673_v3 = vrot.slane %v4659_v60, %v6591_v43 }
 0x5cc   :  { %v4738_v8 = vcombine.low %v4673_v3, %v4689_v13  ;;  %v4739_v9 = vcombine.high %v4673_v3, %v4689_v13  ;;  %v4722_v10 = vcombine.low %v4666_v4, %v4682_v2  ;;  %v4723_v14 = vcombine.high %v4666_v4, %v4682_v2 }
 0x5ce   :  { %v6973_v16 = vrot.slane %v4739_v9, %v6593_v49  ;;  %v4730_v18 = vrot.slane %v4722_v10, %v6593_v49  ;;  %v4746_v6 = vrot.slane %v4738_v8, %v6593_v49  ;;  %v4737_v26 = vrot.slane %v4723_v14, %v6593_v49 }
 0x5cf   :  { %v6981_v27 = vpop.f32.mrb[8].mxu0 }
 0x5d0   :  { %v6146_v21 = vpop.f32.mrb[9].mxu0  ;;  %v4755_v23 = vcombine.high %v4698_v17, %v4730_v18  ;;  %v4754_v24 = vcombine.low %v4698_v17, %v4730_v18  ;;  %v4758_v28 = vcombine.low %v4714_v20, %v4746_v6  ;;  %v4759_v29 = vcombine.high %v4714_v20, %v4746_v6 }
 0x5d1   :  { %v4760_v25 = vcombine.low %v6979_v19, %v6973_v16  ;;  %v4761_v30 = vcombine.high %v6979_v19, %v6973_v16  ;;  %v4756_v36 = vcombine.low %v4705_v62, %v4737_v26  ;;  %v4757_v37 = vcombine.high %v4705_v62, %v4737_v26 }
 0x5d2   :  { %4794 = vxpose.xlu0.b32.start.end [1/1] (short) (narrow) %v4755_v23, 8  ;;  %4762 = vxpose.xlu1.b32.start.end [1/1] (short) (narrow) %v4754_v24, 8 }
 0x5d3   :  { %v6990_v33 = vpop.f32.mrb[10].mxu0  ;;  %v6992_v53 = vpop.f32.mrb[8].mxu1 }
 0x5d4   :  { %v6156_v34 = vpop.f32.mrb[11].mxu0  ;;  %v6161_v35 = vpop.f32.mrb[9].mxu1 }
 0x5d6   :  { %4826 = vxpose.xlu0.b32.start.end [1/1] (short) (narrow) %v4756_v36, 8  ;;  %4858 = vxpose.xlu1.b32.start.end [1/1] (short) (narrow) %v4757_v37, 8 }
 0x5f2   :  { %v4099_v38 = vpop.f32.mrb[12].mxu0  ;;  %v4172_v39 = vpop.f32.mrb[10].mxu1 }
 0x5f3   :  { %v6166_v40 = vpop.f32.mrb[13].mxu0  ;;  %v6171_v41 = vpop.f32.mrb[11].mxu1  ;;  %v4322_v47 = vmul.f32 0.35355338, %v4099_v38  ;;  %v4323_v56 = vmul.f32 0.35355338, %v4172_v39 }
 0x5f5   :  { %v4326_v51 = vsel %vm1604_vm2, %v4322_v47, -inf  ;;  %v4329_v63 = vsel %vm1604_vm2, %v4323_v56, -inf }
 0x5f6   :  { %v4245_v42 = vpop.f32.mrb[14].mxu0  ;;  %v4318_v44 = vpop.f32.mrb[12].mxu1 }
 0x5f7   :  { %v6176_v45 = vpop.f32.mrb[15].mxu0  ;;  %v6181_v46 = vpop.f32.mrb[13].mxu1  ;;  %v4324_v50 = vmul.f32 0.35355338, %v4245_v42  ;;  %v4325_v54 = vmul.f32 0.35355338, %v4318_v44 }
 0x5f9   :  { %v4332_v55 = vsel %vm1604_vm2, %v4324_v50, -inf  ;;  %v4335_v59 = vsel %vm1604_vm2, %v4325_v54, -inf }
 0x5fd   :  { %4327 = vmax.xlane.f32.xlu1 %v4326_v51 }
 0x601   :  { %4333 = vmax.xlane.f32.xlu1 %v4332_v55 }
 0x603   :  { %4330 = vmax.xlane.f32.xlu0 %v4329_v63 }
 0x605   :  { %4336 = vmax.xlane.f32.xlu1 %v4335_v59 }
 0x630   :  { %4890 = vxpose.xlu0.b32.start.end [1/1] (short) (narrow) %v4758_v28, 8 }
 0x638   :  { %4922 = vxpose.xlu1.b32.start.end [1/1] (short) (narrow) %v4759_v29, 8 }
 0x652   :  { %v4778_v48 = vpop.trf.xlu1  ;;  %v4810_v1 = vpop.trf.xlu0 }
 0x656   :  { %v4874_v52 = vpop.trf.xlu1  ;;  %v4842_v61 = vpop.trf.xlu0 }
 0x657   :  { %v5026_v12 = vcombine.low %v4810_v1, %v4874_v52  ;;  %v5018_v0 = vcombine.low %v4778_v48, %v4842_v61 }
 0x659   :  { %v6999_v11 = vrot.slane %v5026_v12, %v6591_v43  ;;  %v7002_v22 = vrot.slane %v5018_v0, %v6591_v43 }
 0x65b   :  { %v5050_v57 = vcombine.low %v7002_v22, %v6999_v11  ;;  %v5051_v60 = vcombine.high %v7002_v22, %v6999_v11 }
 0x65d   :  { %v5058_v46 = vrot.slane %v5050_v57, %v6593_v49  ;;  %v5065_v63 = vrot.slane %v5051_v60, %v6593_v49 }
 0x68a   :  { %v4328_v2 = vpop.xlane.xlu1 %4327 }
 0x68b   :  { %v4338_v13 = vsub.f32 %v4322_v47, %v4328_v2 }
 0x68d   :  { %v4342_v4 = vmul.f32 1.442695, %v4338_v13 }
 0x68e   :  { %v4334_v3 = vpop.xlane.xlu1 %4333 }
 0x68f   :  { %6310 = vpow2.f32 %v4342_v4  ;;  %v4340_v5 = vsub.f32 %v4324_v50, %v4334_v3 }
 0x690   :  { %v4331_v8 = vpop.xlane.xlu0 %4330 }
 0x691   :  { %v4339_v9 = vsub.f32 %v4323_v56, %v4331_v8  ;;  %v4346_v10 = vmul.f32 1.442695, %v4340_v5 }
 0x692   :  { %v4337_v14 = vpop.xlane.xlu1 %4336 }
 0x693   :  { %v4344_v15 = vmul.f32 1.442695, %v4339_v9  ;;  %v4341_v17 = vsub.f32 %v4325_v54, %v4337_v14 }
 0x695   :  { %6312 = vpow2.f32 %v4344_v15  ;;  %v4348_v18 = vmul.f32 1.442695, %v4341_v17 }
 0x696   :  { %6314 = vpow2.f32 %v4346_v10 }
 0x697   :  { %6316 = vpow2.f32 %v4348_v18 }
 0x699   :  { %v6311_v6 = vpop.eup %6310 }
 0x69a   :  { %v4350_v20 = vsel %vm1604_vm2, %v6311_v6, 0.0 }
 0x69b   :  { %4351 = vadd.xlane.f32.xlu0 %v4350_v20 }
 0x69f   :  { %v6313_v21 = vpop.eup %6312 }
 0x6a0   :  { %v6315_v23 = vpop.eup %6314  ;;  %v4353_v24 = vsel %vm1604_vm2, %v6313_v21, 0.0 }
 0x6a1   :  { %v6317_v26 = vpop.eup %6316  ;;  %4354 = vadd.xlane.f32.xlu1 %v4353_v24  ;;  %v4356_v29 = vsel %vm1604_vm2, %v6315_v23, 0.0 }
 0x6a2   :  { %v4359_v28 = vsel %vm1604_vm2, %v6317_v26, 0.0 }
 0x6a3   :  { %4360 = vadd.xlane.f32.xlu0 %v4359_v28 }
 0x6a5   :  { %4357 = vadd.xlane.f32.xlu1 %v4356_v29 }
 0x6b0   :  { %v4906_v62 = vpop.trf.xlu0 }
 0x6b8   :  { %v4938_v35 = vpop.trf.xlu1 }
 0x6d0   :  { %4954 = vxpose.xlu0.b32.start.end [1/1] (short) (narrow) %v4760_v25, 8 }
 0x6d4   :  { %2965 = vxpose.xlu0.b32.start.end [1/1] (short) (narrow) %v6981_v27, 8 }
 0x6d8   :  { %4986 = vxpose.xlu1.b32.start.end [1/1] (short) (narrow) %v4761_v30, 8  ;;  %3029 = vxpose.xlu0.b32.start.end [1/1] (short) (narrow) %v6990_v33, 8 }
 0x6dc   :  { %2997 = vxpose.xlu1.b32.start.end [1/1] (short) (narrow) %v6964_v58, 8 }
 0x6e0   :  { %3061 = vxpose.xlu1.b32.start.end [1/1] (short) (narrow) %v6992_v53, 8 }
 0x728   :  { %v4352_v34 = vpop.xlane.xlu0 %4351 }
 0x729   :  { %6318 = vrcp.f32 %v4352_v34 }
 0x72e   :  { %v4355_v36 = vpop.xlane.xlu1 %4354 }
 0x72f   :  { %6320 = vrcp.f32 %v4355_v36 }
 0x730   :  { %v4361_v58 = vpop.xlane.xlu0 %4360 }
 0x731   :  { %6322 = vrcp.f32 %v4361_v58 }
 0x732   :  { %v4358_v27 = vpop.xlane.xlu1 %4357 }
 0x733   :  { %v6319_v37 = vpop.eup %6318  ;;  %6324 = vrcp.f32 %v4358_v27 }
 0x734   :  { %v4366_v25 = vmul.f32 %v6319_v37, %v6311_v6 }
 0x736   :  { %6183 = vmatpush3.xpose.msk.msra.mxu0 %vm1604_vm2, %v4366_v25 }
 0x737   :  { %6192 = vmatprep.subr.mxu0 %v6410_v31 }
 0x739   :  { %v6321_v16 = vpop.eup %6320 }
 0x73a   :  { %v4367_v19 = vmul.f32 %v6321_v16, %v6313_v21 }
 0x73b   :  { %v6323_v44 = vpop.eup %6322 }
 0x73c   :  { %6188 = vmatpush3.xpose.msk.msra.mxu1 %vm1604_vm2, %v4367_v19  ;;  %v4369_v54 = vmul.f32 %v6323_v44, %v6317_v26 }
 0x73d   :  { %6197 = vmatprep.subr.mxu1 %v6410_v31  ;;  %v6325_v45 = vpop.eup %6324 }
 0x73e   :  { %v4368_v55 = vmul.f32 %v6325_v45, %v6315_v23 }
 0x750   :  { %v4970_v30 = vpop.trf.xlu0 }
 0x751   :  { %v5034_v33 = vcombine.low %v4906_v62, %v4970_v30 }
 0x753   :  { %v5041_v39 = vrot.slane %v5034_v33, %v6591_v43 }
 0x754   :  { %v2981_v1 = vpop.trf.xlu0 }
 0x758   :  { %v5002_v53 = vpop.trf.xlu1  ;;  %v3045_v61 = vpop.trf.xlu0 }
 0x759   :  { %v5042_v38 = vcombine.low %v4938_v35, %v5002_v53  ;;  %v3093_v0 = vcombine.low %v2981_v1, %v3045_v61  ;;  %v3094_v11 = vcombine.high %v2981_v1, %v3045_v61 }
 0x75b   :  { %v5049_v40 = vrot.slane %v5042_v38, %v6591_v43  ;;  %v3108_v3 = vrot.slane %v3094_v11, %v6591_v43 }
 0x75c   :  { %v3013_v52 = vpop.trf.xlu1 }
 0x75d   :  { %v5066_v41 = vcombine.low %v5041_v39, %v5049_v40  ;;  %v5067_v42 = vcombine.high %v5041_v39, %v5049_v40 }
 0x75f   :  { %v5074_v47 = vrot.slane %v5066_v41, %v6593_v49  ;;  %v5081_v50 = vrot.slane %v5067_v42, %v6593_v49 }
 0x760   :  { %v3077_v12 = vpop.trf.xlu1 }
 0x761   :  { %v5082_v51 = vcombine.low %v5058_v46, %v5074_v47  ;;  %v5083_v56 = vcombine.high %v5058_v46, %v5074_v47  ;;  %v5084_v59 = vcombine.low %v5065_v63, %v5081_v50  ;;  %v5085_v48 = vcombine.high %v5065_v63, %v5081_v50 }
 0x762   :  { %v3109_v22 = vcombine.low %v3013_v52, %v3077_v12  ;;  %v3110_v57 = vcombine.high %v3013_v52, %v3077_v12 }
 0x763   :  { %6185 = vmatmul.mubr.msk.f32.vlgmr.msra.gmra.mrb[16].mxu0 %vm1604_vm2, %v5082_v51  ;;  %6190 = vmatmul.mubr.msk.f32.vlgmr.msra.gmra.mrb[14].mxu1 %vm1604_vm2, %v5083_v56 }
 0x764   :  { %6193 = vmatpush3.xpose.msk.msra.mxu0 %vm1604_vm2, %v4368_v55  ;;  %6198 = vmatpush3.xpose.msk.msra.mxu1 %vm1604_vm2, %v4369_v54  ;;  %v3117_v5 = vrot.slane %v3109_v22, %v6591_v43  ;;  %v3124_v8 = vrot.slane %v3110_v57, %v6591_v43 }
 0x765   :  { %6194 = vmatprep.mubr.msk.f32.mxu0 %vm6416_vm1, %v6410_v31  ;;  %6199 = vmatprep.mubr.msk.f32.mxu1 %vm6416_vm1, %v6410_v31  ;;  %v3101_v31 = vrot.slane %v3093_v0, %v6591_v43 }
 0x766   :  { %v3141_v6 = vcombine.low %v3108_v3, %v3124_v8  ;;  %v3142_v20 = vcombine.high %v3108_v3, %v3124_v8 }
 0x767   :  { %6195 = vmatmul.mubr.msk.f32.vlgmr.msra.gmra.mrb[18].mxu0 %vm1604_vm2, %v5084_v59  ;;  %6200 = vmatmul.mubr.msk.f32.vlgmr.msra.gmra.mrb[16].mxu1 %vm1604_vm2, %v5085_v48  ;;  %v3125_v17 = vcombine.low %v3101_v31, %v3117_v5  ;;  %v3126_v18 = vcombine.high %v3101_v31, %v3117_v5 }
 0x768   :  { %v3149_v24 = vrot.slane %v3141_v6, %v6593_v49  ;;  %v3156_v26 = vrot.slane %v3142_v20, %v6593_v49 }
 0x769   :  { %v3133_v21 = vrot.slane %v3125_v17, %v6593_v49  ;;  %v3140_v23 = vrot.slane %v3126_v18, %v6593_v49 }
 0x76a   :  { %v3177_v62 = vcombine.low %v3149_v24, %v3156_v26  ;;  %v5996_v34 = vcombine.high %v3149_v24, %v3156_v26 }
 0x76b   :  { %v3161_v28 = vcombine.low %v3133_v21, %v3140_v23  ;;  %v5995_v29 = vcombine.high %v3133_v21, %v3140_v23 }
 0x76c   :  { %v3184_v37 = vrot.slane %v3177_v62, %v6591_v43  ;;  %v3192_v25 = vrot.slane %v5996_v34, %v6591_v43 }
 0x76d   :  { %v3168_v35 = vrot.slane %v3161_v28, %v6591_v43  ;;  %v3176_v36 = vrot.slane %v5995_v29, %v6591_v43 }
 0x76e   :  { %v3210_v19 = vcombine.high %v3184_v37, %v3192_v25  ;;  %v3209_v53 = vcombine.low %v3184_v37, %v3192_v25 }
 0x76f   :  { %v3194_v16 = vcombine.high %v3168_v35, %v3176_v36  ;;  %v3193_v33 = vcombine.low %v3168_v35, %v3176_v36 }
 0x770   :  { %v3224_v27 = vrot.slane %v3210_v19, %v6593_v49  ;;  %v3217_v40 = vrot.slane %v3209_v53, %v6593_v49 }
 0x771   :  { %v3208_v58 = vrot.slane %v3194_v16, %v6593_v49  ;;  %v3201_v39 = vrot.slane %v3193_v33, %v6593_v49 }
 0x773   :  { %v3227_v30 = vcombine.low %v3208_v58, %v3224_v27  ;;  %v3228_v38 = vcombine.high %v3208_v58, %v3224_v27  ;;  %v3226_v41 = vcombine.high %v3201_v39, %v3217_v40  ;;  %v3225_v28 = vcombine.low %v3201_v39, %v3217_v40 }
 0x836   :  { %v5158_v60 = vpop.f32.mrb[16].mxu0  ;;  %v5234_v2 = vpop.f32.mrb[14].mxu1 }
 0x837   :  { %5422 = vxpose.xlu1.b32.start.end [1/1] (short) (narrow) %v5234_v2, 8  ;;  %v6191_v13 = vpop.f32.mrb[15].mxu1  ;;  %5390 = vxpose.xlu0.b32.start.end [1/1] (short) (narrow) %v5158_v60, 8  ;;  %v6186_v4 = vpop.f32.mrb[17].mxu0 }
 0x83a   :  { %v5310_v9 = vpop.f32.mrb[18].mxu0  ;;  %v5386_v10 = vpop.f32.mrb[16].mxu1 }
 0x83b   :  { %5486 = vxpose.xlu1.b32.start.end [1/1] (short) (narrow) %v5386_v10, 8  ;;  %v6201_v14 = vpop.f32.mrb[17].mxu1  ;;  %5454 = vxpose.xlu0.b32.start.end [1/1] (short) (narrow) %v5310_v9, 8  ;;  %v6196_v15 = vpop.f32.mrb[19].mxu0 }
 0x859   :  { %3234 = vrot.lane.b32.xlu1 %v3227_v30, %s6417_s6 }
 0x85d   :  { %3238 = vrot.lane.b32.xlu1 %v3228_v38, %s6418_s0 }
 0x864   :  { %3230 = vrot.lane.b32.xlu0 %v3226_v41, %s6408_s29 }
 0x8b7   :  { %v5406_v42 = vpop.trf.xlu0  ;;  %v5438_v44 = vpop.trf.xlu1 }
 0x8bb   :  { %v5470_v45 = vpop.trf.xlu0  ;;  %v5502_v46 = vpop.trf.xlu1 }
 0x8bc   :  { %v5518_v47 = vcombine.low %v5406_v42, %v5470_v45  ;;  %v5519_v50 = vcombine.high %v5406_v42, %v5470_v45  ;;  %v5534_v51 = vcombine.low %v5438_v44, %v5502_v46  ;;  %v5535_v56 = vcombine.high %v5438_v44, %v5502_v46 }
 0x8be   :  { %v5526_v54 = vrot.slane %v5518_v47, %v6591_v43  ;;  %v5533_v55 = vrot.slane %v5519_v50, %v6591_v43  ;;  %v5542_v63 = vrot.slane %v5534_v51, %v6591_v43  ;;  %v5549_v59 = vrot.slane %v5535_v56, %v6591_v43  ;;  %v5715_v47 = vld [vmem:[#allocation5] sm:$0xff]  ;;  %v5716_v50 = vld [vmem:[#allocation5 + $0x8] sm:$0xff]  ;;  %v5717_v51 = vld [vmem:[#allocation5 + $0x10] sm:$0xff] }
 0x8bf   :  { %v5718_v56 = vld [vmem:[#allocation5 + $0x18] sm:$0xff] }
 0x8c0   :  { %v5550_v48 = vcombine.low %v5526_v54, %v5542_v63  ;;  %v5551_v1 = vcombine.high %v5526_v54, %v5542_v63  ;;  %v5566_v52 = vcombine.low %v5533_v55, %v5549_v59  ;;  %v5567_v61 = vcombine.high %v5533_v55, %v5549_v59  ;;  %v5809_v55 = vld [vmem:[%s7170_s11] sm:$0xff]  ;;  %v5810_v63 = vld [vmem:[%s7170_s11 + $0x8] sm:$0xff]  ;;  %v5811_v59 = vld [vmem:[%s7170_s11 + $0x10] sm:$0xff] }
 0x8c1   :  { %v6260_v54 = vpack.c.bf16 %v5718_v56, %v5717_v51  ;;  %v6021_v51 = vld [vmem:[%s7172_s13] ss:$0 sm:$0xff] }
 0x8c2   :  { %v5558_v12 = vrot.slane %v5550_v48, %v6593_v49  ;;  %v5565_v0 = vrot.slane %v5551_v1, %v6593_v49  ;;  %v5574_v11 = vrot.slane %v5566_v52, %v6593_v49  ;;  %v5581_v22 = vrot.slane %v5567_v61, %v6593_v49  ;;  %v5812_v1 = vld [vmem:[%s7170_s11 + $0x18] sm:$0xff]  ;;  %v5813_v61 = vld [vmem:[%s7170_s11 + $0x20] sm:$0xff] }
 0x8c3   :  { %v6264_v48 = vpack.c.bf16 %v5810_v63, %v5809_v55  ;;  %v6268_v52 = vpack.c.bf16 %v5812_v1, %v5811_v59  ;;  %v6022_v63 = vld [vmem:[%s7173_s14] ss:$0 sm:$0xff] }
 0x8c4   :  { %v5586_v57 = vcombine.low %v5558_v12, %v5565_v0  ;;  %v6011_v60 = vcombine.high %v5558_v12, %v5565_v0  ;;  %v5602_v2 = vcombine.low %v5574_v11, %v5581_v22  ;;  %v6012_v13 = vcombine.high %v5574_v11, %v5581_v22  ;;  %v5814_v12 = vld [vmem:[%s7170_s11 + $0x28] sm:$0xff] }
 0x8c5   :  { %6265 = vmatprep.subr.bf16.mxu1 %v6264_v48  ;;  %v6272_v0 = vpack.c.bf16 %v5814_v12, %v5813_v61 }
 0x8c6   :  { %v5593_v4 = vrot.slane %v5586_v57, %v6591_v43  ;;  %v5601_v31 = vrot.slane %v6011_v60, %v6591_v43  ;;  %v5609_v3 = vrot.slane %v5602_v2, %v6591_v43  ;;  %v5617_v5 = vrot.slane %v6012_v13, %v6591_v43  ;;  %6267 = vmatpush3.bf16.msra.mxu1 %v6264_v48  ;;  %v6013_v2 = vld [vmem:[%s7166_s7] ss:$0 sm:$0xff] }
 0x8c7   :  { %6269 = vmatprep.subr.bf16.mxu1 %v6268_v52 }
 0x8c8   :  { %v5619_v8 = vcombine.high %v5593_v4, %v5601_v31  ;;  %v5635_v9 = vcombine.high %v5609_v3, %v5617_v5  ;;  %v5618_v10 = vcombine.low %v5593_v4, %v5601_v31  ;;  %v5634_v14 = vcombine.low %v5609_v3, %v5617_v5  ;;  %v6014_v4 = vld [vmem:[%s7167_s8] ss:$0 sm:$0xff] }
 0x8ca   :  { %v5633_v15 = vrot.slane %v5619_v8, %v6593_v49  ;;  %v5649_v17 = vrot.slane %v5635_v9, %v6593_v49  ;;  %v5626_v18 = vrot.slane %v5618_v10, %v6593_v49  ;;  %v5642_v6 = vrot.slane %v5634_v14, %v6593_v49  ;;  %6271 = vmatpush3.bf16.msra.mxu1 %v6268_v52 }
 0x8cb   :  { %v3235_v24 = vpop.permute.xlu1 %3234  ;;  %6273 = vmatprep.subr.bf16.mxu1 %v6272_v0 }
 0x8cc   :  { %v5652_v20 = vcombine.low %v5633_v15, %v5649_v17  ;;  %v5651_v21 = vcombine.high %v5626_v18, %v5642_v6  ;;  %v5650_v23 = vcombine.low %v5626_v18, %v5642_v6  ;;  %v5653_v43 = vcombine.high %v5633_v15, %v5649_v17  ;;  %v5815_v18 = vld [vmem:[%s7170_s11 + $0x30] sm:$0xff]  ;;  %v5816_v6 = vld [vmem:[%s7170_s11 + $0x38] sm:$0xff] }
 0x8ce   :  { %5659 = vrot.lane.b32.xlu0 %v5652_v20, %s6417_s6  ;;  %5655 = vrot.lane.b32.xlu1 %v5651_v21, %s6408_s29  ;;  %v6276_v20 = vpack.c.bf16 %v5816_v6, %v5815_v18  ;;  %v6015_v21 = vld [vmem:[%s7169_s10] ss:$0 sm:$0xff] }
 0x8cf   :  { %v3239_v34 = vpop.permute.xlu1 %3238  ;;  %6275 = vmatpush3.bf16.msra.mxu1 %v6272_v0 }
 0x8d0   :  { %6277 = vmatprep.subr.bf16.mxu1 %v6276_v20 }
 0x8d2   :  { %5663 = vrot.lane.b32.xlu1 %v5653_v43, %s6418_s0 }
 0x8d3   :  { %6279 = vmatpush3.bf16.msra.mxu1 %v6276_v20 }
 0x8d6   :  { %v3231_v26 = vpop.permute.xlu0 %3230 }
 0x8d7   :  { %v3241_v29 = vsel %vm1604_vm2, %v3225_v28, %v3231_v26 }
 0x8d8   :  { %v3243_v62 = vsel %vm3242_vm3, %v3241_v29, %v3235_v24 }
 0x8d9   :  { %v3245_v49 = vsel %vm3244_vm4, %v3243_v62, %v3239_v34  ;;  %v6018_v62 = vld [vmem:[%s7171_s12] ss:$0 sm:$0xff] }
 0x8da   :  { %v5669_v35 = vadd.f32 %v3245_v49, %v6586_v32 }
 0x8dc   :  { %v5671_v36 = vsel %vm92_vm0, %v5669_v35, 0.0 }
 0x8ed   :  { %5672 = vadd.xlane.f32.xlu0 %v5671_v36 }
 0x940   :  { %v5656_v37 = vpop.permute.xlu1 %5655  ;;  %v5660_v25 = vpop.permute.xlu0 %5659 }
 0x941   :  { %v5666_v16 = vsel %vm1604_vm2, %v5650_v23, %v5656_v37 }
 0x942   :  { %v5667_v19 = vsel %vm3242_vm3, %v5666_v16, %v5660_v25 }
 0x944   :  { %v5664_v58 = vpop.permute.xlu1 %5663 }
 0x945   :  { %v5668_v27 = vsel %vm3244_vm4, %v5667_v19, %v5664_v58 }
 0x946   :  { %v5670_v30 = vadd.f32 %v5668_v27, %v6816_v7  ;;  %v6256_v7 = vpack.c.bf16 %v5716_v50, %v5715_v47 }
 0x948   :  { %v5674_v33 = vsel %vm92_vm0, %v5670_v30, 0.0  ;;  %6257 = vmatprep.subr.bf16.mxu0 %v6256_v7 }
 0x949   :  { %5675 = vadd.xlane.f32.xlu1 %v5674_v33  ;;  %6259 = vmatpush3.bf16.msra.mxu0 %v6256_v7 }
 0x94a   :  { %6261 = vmatprep.subr.bf16.mxu0 %v6260_v54 }
 0x94d   :  { %6263 = vmatpush3.bf16.msra.mxu0 %v6260_v54 }
 0x97a   :  { %v5673_v53 = vpop.xlane.xlu0 %5672 }
 0x97b   :  { %v5677_v38 = vmul.f32 0.03125, %v5673_v53 }
 0x97d   :  { %v5679_v39 = vsub.f32 %v5669_v35, %v5677_v38 }
 0x97f   :  { %v5681_v40 = vmul.f32 %v5679_v39, %v5679_v39 }
 0x981   :  { %v5683_v32 = vsel %vm92_vm0, %v5681_v40, 0.0 }
 0x982   :  { %5684 = vadd.xlane.f32.xlu0 %v5683_v32 }
 0x9d6   :  { %v5676_v41 = vpop.xlane.xlu1 %5675 }
 0x9d7   :  { %v5678_v42 = vmul.f32 0.03125, %v5676_v41 }
 0x9d9   :  { %v5680_v44 = vsub.f32 %v5670_v30, %v5678_v42 }
 0x9db   :  { %v5682_v45 = vmul.f32 %v5680_v44, %v5680_v44 }
 0x9dd   :  { %v5686_v46 = vsel %vm92_vm0, %v5682_v45, 0.0 }
 0x9de   :  { %5687 = vadd.xlane.f32.xlu0 %v5686_v46 }
 0xa0f   :  { %v5685_v11 = vpop.xlane.xlu0 %5684 }
 0xa10   :  { %v5689_v22 = vmul.f32 0.03125, %v5685_v11 }
 0xa12   :  { %v5691_v57 = vadd.f32 1e-05, %v5689_v22 }
 0xa14   :  { %6326 = vrsqrt.f32 %v5691_v57 }
 0xa1e   :  { %v6327_v60 = vpop.eup %6326 }
 0xa1f   :  { %v5695_v13 = vmul.f32 %v6327_v60, %v5679_v39 }
 0xa21   :  { %v5704_v31 = vmul.f32 %v6013_v2, %v5695_v13 }
 0xa23   :  { %v5713_v3 = vadd.f32 %v6014_v4, %v5704_v31 }
 0xa25   :  { %6210 = vmatprep.mubr.msk.f32.mxu0 %vm92_vm0, %v5713_v3 }
 0xa6b   :  { %v5688_v5 = vpop.xlane.xlu0 %5687 }
 0xa6c   :  { %v5690_v8 = vmul.f32 0.03125, %v5688_v5 }
 0xa6e   :  { %v5692_v9 = vadd.f32 1e-05, %v5690_v8 }
 0xa70   :  { %6328 = vrsqrt.f32 %v5692_v9 }
 0xa7a   :  { %v6329_v10 = vpop.eup %6328 }
 0xa7b   :  { %v5696_v14 = vmul.f32 %v6329_v10, %v5680_v44 }
 0xa7d   :  { %v5705_v15 = vmul.f32 %v6013_v2, %v5696_v14 }
 0xa7f   :  { %v5714_v17 = vadd.f32 %v6014_v4, %v5705_v15 }
 0xa81   :  { %6211 = vmatmul.mubr.msk.f32.vlgmr.msra.gmra.mrb[20].mxu0 %vm92_vm0, %v5714_v17 }
 0xb54   :  { %v6212_v23 = vpop.f32.mrb[20].mxu0 }
 0xb55   :  { %v5804_v43 = vadd.f32 %v6212_v23, %v6015_v21  ;;  %v5798_v24 = vpop.f32.mrb[21].mxu0 }
 0xb56   :  { %v5799_v26 = vadd.f32 %v6015_v21, %v5798_v24 }
 0xb57   :  { %v5808_v29 = vmax.f32 %v5804_v43, 0.0 }
 0xb58   :  { %v5807_v28 = vmax.f32 %v5799_v26, 0.0 }
 0xb5a   :  { %6229 = vmatprep.mubr.msk.f32.mxu1 %vm5824_vm5, %v5807_v28 }
 0xb5b   :  { %6230 = vmatmul.mubr.msk.f32.vlgmr.msra.gmra.mrb[18].mxu1 %vm5824_vm5, %v5808_v29 }
 0xc2e   :  { %v6231_v34 = vpop.f32.mrb[18].mxu1 }
 0xc2f   :  { %v5903_v49 = vadd.f32 %v6231_v34, %v6018_v62  ;;  %v5897_v35 = vpop.f32.mrb[19].mxu1 }
 0xc30   :  { %v5898_v36 = vadd.f32 %v6018_v62, %v5897_v35 }
 0xc31   :  { %v5907_v37 = vadd.f32 %v5903_v49, %v5714_v17 }
 0xc32   :  { %v5906_v25 = vadd.f32 %v5898_v36, %v5713_v3 }
 0xc33   :  { %v5911_v16 = vsel %vm92_vm0, %v5907_v37, 0.0 }
 0xc34   :  { %5912 = vadd.xlane.f32.xlu0 %v5911_v16  ;;  %v5908_v19 = vsel %vm92_vm0, %v5906_v25, 0.0 }
 0xc35   :  { %5909 = vadd.xlane.f32.xlu1 %v5908_v19 }
 0xcc1   :  { %v5913_v58 = vpop.xlane.xlu0 %5912 }
 0xcc2   :  { %v5915_v27 = vmul.f32 0.03125, %v5913_v58  ;;  %v5910_v30 = vpop.xlane.xlu1 %5909 }
 0xcc3   :  { %v5914_v33 = vmul.f32 0.03125, %v5910_v30 }
 0xcc4   :  { %v5917_v53 = vsub.f32 %v5907_v37, %v5915_v27 }
 0xcc5   :  { %v5916_v38 = vsub.f32 %v5906_v25, %v5914_v33 }
 0xcc6   :  { %v5919_v39 = vmul.f32 %v5917_v53, %v5917_v53 }
 0xcc7   :  { %v5918_v40 = vmul.f32 %v5916_v38, %v5916_v38 }
 0xcc8   :  { %v5923_v32 = vsel %vm92_vm0, %v5919_v39, 0.0 }
 0xcc9   :  { %5924 = vadd.xlane.f32.xlu0 %v5923_v32  ;;  %v5920_v41 = vsel %vm92_vm0, %v5918_v40, 0.0 }
 0xcca   :  { %5921 = vadd.xlane.f32.xlu1 %v5920_v41 }
 0xd56   :  { %v5925_v42 = vpop.xlane.xlu0 %5924 }
 0xd57   :  { %v5927_v44 = vmul.f32 0.03125, %v5925_v42  ;;  %v5922_v45 = vpop.xlane.xlu1 %5921 }
 0xd58   :  { %v5926_v46 = vmul.f32 0.03125, %v5922_v45 }
 0xd59   :  { %v5929_v47 = vadd.f32 1e-05, %v5927_v44 }
 0xd5a   :  { %v5928_v50 = vadd.f32 1e-05, %v5926_v46 }
 0xd5b   :  { %6330 = vrsqrt.f32 %v5929_v47 }
 0xd5c   :  { %6332 = vrsqrt.f32 %v5928_v50 }
 0xd65   :  { %v6331_v7 = vpop.eup %6330 }
 0xd66   :  { %v6333_v56 = vpop.eup %6332  ;;  %v5933_v54 = vmul.f32 %v6331_v7, %v5917_v53 }
 0xd67   :  { %v5932_v55 = vmul.f32 %v6333_v56, %v5916_v38 }
 0xd68   :  { %v5942_v59 = vmul.f32 %v6021_v51, %v5933_v54 }
 0xd69   :  { %v5941_v48 = vmul.f32 %v6021_v51, %v5932_v55 }
 0xd6a   :  { %v5951_v1 = vadd.f32 %v6022_v63, %v5942_v59 }
 0xd6b   :  { %v5950_v52 = vadd.f32 %v6022_v63, %v5941_v48 }
 0xd6c   :  { %5953 = vst.msk [vmem:[#allocation7 + $0x8] sm:$0xff] %vm92_vm0, %v5951_v1 }
 0xd6d   :  { %5952 = vst.msk [vmem:[#allocation7] sm:$0xff] %vm92_vm0, %v5950_v52 }
 0xd6e   :  { %6389 = shalt.err (!%p6386_p6)
}
 0xd6f   :  { %s6390_s17 = scalar_lea.hbm %s7174_s15, 256 }
 0xd70   :  { %p6391_p7 = scmp.ne.s32.totalorder %s7174_s15, %s6390_s17  ;;  %p6394_p8 = scmp.lt.u32.totalorder %s6390_s17, %s7174_s15 }
 0xd72   :  { %p6396_p9 = pnand %p6394_p8, %p6391_p7 }
 0xd74   :  { %6399 = shalt.err (!%p6396_p9)
}
 0xd75   :  { %5965 = dma.vmem_to_hbm [thread:$0]  %s5960_s16, 256, %s7174_s15, [#allocation4], %s6407_s28, %s6407_s28, %s6408_s29  }
 0xd76   :  { %6404 = dma.done.wait [#allocation4], 256  }
 0xd77   :  { %6405 = vsyncadd [#allocation4], 4294967040 }
 0xd78   :  { %5969 = vsyncpa [#allocation3], 1 }
 0xd79   :  { %5970 = vsyncpa [#allocation6], 1 }
 0xd7a   :  { %5971 = vsyncpa [#allocation4], 1 }

</bundles_post_ra>
